<compile_context>
chip_gen: v6e
topology: v6e:2x2x1
jax: 0.10.0
libtpu: 0.0.40
codegen_flags: <defaults>
</compile_context>

<pallas_src>
import math

import numpy as np
import jax
import jax.numpy as jnp
from jax.experimental import pallas as pl
from jax.experimental.pallas import tpu as pltpu


def disc_block_forward(x, w_conv1, b_conv1, w_conv2, b_conv2, w_skip):
    """DiscBlock forward (sample=True). x: (B, Cin, H, W) NCHW, returns (B, Cout, H//2, W//2)."""
    B, Cin, H, W = x.shape
    Cout = w_conv1.shape[0]
    assert H % 2 == 0 and W % 2 == 0
    Ho, Wo = H // 2, W // 2

    slope = 0.2
    act_gain = math.sqrt(2.0)

    # Geometry of the flattened zero-padded plane (spatial lives on the lane axis).
    Wp, Hp = W + 2, H + 2
    L = Hp * Wp                      # flattened padded plane length
    MARG = Wp + 1                    # max |tap shift|; zero margin on each side
    Lext = L + 2 * MARG

    K1 = 9 * Cin                     # conv1 contraction depth (9 taps x Cin)
    K2 = 9 * Cout + Cin              # conv2 taps + fused 1x1 skip

    # Equalized-LR scales.
    s1 = 1.0 / math.sqrt(Cin * 9)
    s2 = 1.0 / math.sqrt(Cout * 9)
    ss = 1.0 / math.sqrt(Cin)

    f32 = jnp.float32

    # ---- fold ELR scales / sqrt(2) gain into the weights (traceable jnp ops; weights are tiny).
    w1_cat = (jnp.transpose(w_conv1.astype(f32), (0, 2, 3, 1))
              .reshape(Cout, K1) * s1)                                   # (Cout, 9*Cin)
    w2_conv = (jnp.transpose(w_conv2.astype(f32), (0, 2, 3, 1))
               .reshape(Cout, 9 * Cout) * (s2 * act_gain))               # sqrt(2) folded here
    w_skip_mat = w_skip[:, :, 0, 0].astype(f32) * ss                     # (Cout, Cin)
    w2_cat = jnp.concatenate([w2_conv, w_skip_mat], axis=1)              # (Cout, 9*Cout+Cin)
    bias2 = jnp.stack([b_conv1.astype(f32), b_conv2.astype(f32)], axis=1)  # (Cout, 2)

    # ---- shape-only constants (numpy; no dependence on traced values).
    m2 = np.zeros((Hp, Wp), np.float32)
    m2[1:H + 1, 1:W + 1] = 1.0
    interior_mask = m2.reshape(1, L)                                     # 1 inside, 0 on pad frame
    scol = np.zeros((W, Wo), np.float32)
    scol[np.arange(Wo) * 2, np.arange(Wo)] = 1.0                         # even-column selector

    # flat-index shift of each of the 9 taps relative to the output position
    taps = [(dy - 1) * Wp + (dx - 1) for dy in range(3) for dx in range(3)]

    def kernel(x_ref, w1_ref, w2_ref, b_ref, mask_ref, scol_ref, out_ref,
               xext_ref, hext_ref, cat_ref, yrw_ref):
        # ---- stage x into the zero-bordered flat scratch (in-kernel padding; no HBM pad pass).
        # Only the pad frame / margins strictly need zeros, but the fill is just (Cin, Lext)
        # in this layout and keeps every grid step self-contained under megacore splitting.
        xext_ref[...] = jnp.zeros_like(xext_ref)
        for r in range(H):
            dst = MARG + (r + 1) * Wp + 1
            xext_ref[:, dst:dst + W] = x_ref[:, r * W:(r + 1) * W]

        # ---- conv1: stack the 9 shifted taps along K -> ONE matmul with K = 9*Cin.
        for t, s in enumerate(taps):
            cat_ref[t * Cin:(t + 1) * Cin, :] = xext_ref[:, MARG + s:MARG + s + L]
        h = jnp.dot(w1_ref[...], cat_ref[0:K1, :], preferred_element_type=f32)
        h = (h + b_ref[:, 0:1]) * mask_ref[...]        # bias, then zero the pad frame
        h = jnp.maximum(h, slope * h)                  # LeakyReLU; sqrt(2) gain lives in w2

        # ---- stage h (its pad frame is already exactly zero) for conv2's shifted taps.
        # hext never needs re-zeroing: its L-region is fully overwritten each step and its
        # margins only feed output columns that are never extracted.
        hext_ref[:, MARG:MARG + L] = h

        # ---- conv2 (3x3) + fused 1x1 skip: ONE matmul with K = 9*Cout + Cin.
        for t, s in enumerate(taps):
            cat_ref[t * Cout:(t + 1) * Cout, :] = hext_ref[:, MARG + s:MARG + s + L]
        cat_ref[9 * Cout:9 * Cout + Cin, :] = xext_ref[:, MARG:MARG + L]   # skip center tap
        y = jnp.dot(w2_ref[...], cat_ref[0:K2, :], preferred_element_type=f32)
        y = y + b_ref[:, 1:2]

        # ---- downsample (::2, ::2): even rows are contiguous lane slices; even columns via
        # one tiny selector matmul.  No strided (masked) loads, lane-dense output store.
        for i in range(Ho):
            src = (2 * i + 1) * Wp + 1
            yrw_ref[i * Cout:(i + 1) * Cout, :] = y[:, src:src + W]
        o = jnp.dot(yrw_ref[...], scol_ref[...], preferred_element_type=f32)   # (Ho*Cout, Wo)
        for i in range(Ho):
            out_ref[:, i * Wo:(i + 1) * Wo] = o[i * Cout:(i + 1) * Cout, :]

    def const_spec(shape):
        # grid-invariant operands: single-buffered (no pointless double-buffer VMEM).
        return pl.BlockSpec(shape, lambda b: (0, 0), pipeline_mode=pl.Buffered(1))

    out_flat = pl.pallas_call(
        kernel,
        out_shape=jax.ShapeDtypeStruct((B, Cout, Ho * Wo), f32),
        grid=(B,),
        in_specs=[
            pl.BlockSpec((None, Cin, H * W), lambda b: (b, 0, 0)),
            const_spec((Cout, K1)),
            const_spec((Cout, K2)),
            const_spec((Cout, 2)),
            const_spec((1, L)),
            const_spec((W, Wo)),
        ],
        out_specs=pl.BlockSpec((None, Cout, Ho * Wo), lambda b: (b, 0, 0)),
        scratch_shapes=[
            pltpu.VMEM((Cin, Lext), f32),        # zero-bordered flat x
            pltpu.VMEM((Cout, Lext), f32),       # flat h staging (margins never read for output)
            pltpu.VMEM((K2, L), f32),            # stacked-tap (im2col-in-K) matmul RHS
            pltpu.VMEM((Ho * Cout, W), f32),     # even-row gather before column selection
        ],
        compiler_params=pltpu.CompilerParams(
            dimension_semantics=("parallel",)),
    )(x.reshape(B, Cin, H * W).astype(f32), w1_cat, w2_cat, bias2,
      jnp.asarray(interior_mask), jnp.asarray(scol))

    # free reshape back to NCHW (B, Cout, Ho, Wo)
    return out_flat.reshape(B, Cout, Ho, Wo)


# ----------------------------------------------------------------------------
# Pure-JAX reference (mirrors the PyTorch module exactly), for verification.
# ----------------------------------------------------------------------------
def reference_forward(x, w_conv1, b_conv1, w_conv2, b_conv2, w_skip):
    B, Cin, H, W = x.shape
    s1 = 1.0 / math.sqrt(Cin * 9)
    s2 = 1.0 / math.sqrt(w_conv1.shape[0] * 9)
    ss = 1.0 / math.sqrt(Cin)
    dn = ("NCHW", "OIHW", "NCHW")

    h = jax.lax.conv_general_dilated(x * s1, w_conv1, (1, 1), ((1, 1), (1, 1)),
                                     dimension_numbers=dn)
    h = h + b_conv1[None, :, None, None]
    h = jnp.where(h >= 0, h, 0.2 * h) * math.sqrt(2.0)
    h = jax.lax.conv_general_dilated(h * s2, w_conv2, (1, 1), ((1, 1), (1, 1)),
                                     dimension_numbers=dn)
    h = h + b_conv2[None, :, None, None]
    sk = jax.lax.conv_general_dilated(x * ss, w_skip, (1, 1), ((0, 0), (0, 0)),
                                      dimension_numbers=dn)
    return h[:, :, ::2, ::2] + sk[:, :, ::2, ::2]


if __name__ == "__main__":
    B, Cin, Cout, H, W = 2, 4, 8, 16, 16

    key = jax.random.PRNGKey(0)
    ks = jax.random.split(key, 6)
    x = jax.random.normal(ks[0], (B, Cin, H, W), jnp.float32)
    w_conv1 = jax.random.normal(ks[1], (Cout, Cin, 3, 3), jnp.float32) * 0.3
    b_conv1 = jax.random.normal(ks[2], (Cout,), jnp.float32) * 0.1
    w_conv2 = jax.random.normal(ks[3], (Cout, Cout, 3, 3), jnp.float32) * 0.3
    b_conv2 = jax.random.normal(ks[4], (Cout,), jnp.float32) * 0.1
    w_skip = jax.random.normal(ks[5], (Cout, Cin, 1, 1), jnp.float32) * 0.3

    out = disc_block_forward(x, w_conv1, b_conv1, w_conv2, b_conv2, w_skip)
    out = jax.block_until_ready(out)

    ref = reference_forward(x, w_conv1, b_conv1, w_conv2, b_conv2, w_skip)
    assert out.shape == (B, Cout, H // 2, W // 2)
    err = float(np.max(np.abs(np.asarray(out) - np.asarray(ref))))
    assert np.allclose(np.asarray(out), np.asarray(ref),
                       rtol=1e-3, atol=1e-3), err
    print("KERNEL_OK")
</pallas_src>

<mosaic_0001>
module attributes {stable_mosaic.version = 11 : i64} {
  func.func @kernel(%arg0: i32, %arg1: memref<1x4x256xf32, #tpu.memory_space<vmem>>, %arg2: memref<8x36xf32, #tpu.memory_space<vmem>>, %arg3: memref<8x76xf32, #tpu.memory_space<vmem>>, %arg4: memref<8x2xf32, #tpu.memory_space<vmem>>, %arg5: memref<1x324xf32, #tpu.memory_space<vmem>>, %arg6: memref<16x8xf32, #tpu.memory_space<vmem>>, %arg7: memref<1x8x64xf32, #tpu.memory_space<vmem>>, %arg8: memref<4x362xf32, #tpu.memory_space<vmem>>, %arg9: memref<8x362xf32, #tpu.memory_space<vmem>>, %arg10: memref<76x324xf32, #tpu.memory_space<vmem>>, %arg11: memref<64x16xf32, #tpu.memory_space<vmem>>) attributes {dimension_semantics = [#tpu.dimension_semantics<parallel>], iteration_bounds = array<i64: 2>, scalar_prefetch = 0 : i64, scratch_operands = 4 : i64, tpu.core_type = #tpu.core_type<tc>, window_params = [{transform_indices = @transform_0, window_bounds = array<i64: 1, 4, 256>}, {pipeline_mode = #tpu.pipeline_mode<synchronous>, transform_indices = @transform_1, window_bounds = array<i64: 8, 36>}, {pipeline_mode = #tpu.pipeline_mode<synchronous>, transform_indices = @transform_2, window_bounds = array<i64: 8, 76>}, {pipeline_mode = #tpu.pipeline_mode<synchronous>, transform_indices = @transform_3, window_bounds = array<i64: 8, 2>}, {pipeline_mode = #tpu.pipeline_mode<synchronous>, transform_indices = @transform_4, window_bounds = array<i64: 1, 324>}, {pipeline_mode = #tpu.pipeline_mode<synchronous>, transform_indices = @transform_5, window_bounds = array<i64: 16, 8>}, {transform_indices = @transform_6, window_bounds = array<i64: 1, 8, 64>}]} {
    %cst = arith.constant 0.000000e+00 : f32
    %0 = vector.broadcast %cst : f32 to vector<4x362xf32>
    %c0 = arith.constant 0 : index
    %c0_0 = arith.constant 0 : index
    %1 = vector.load %arg8[%c0, %c0_0] : memref<4x362xf32, #tpu.memory_space<vmem>>, vector<4x362xf32>
    tpu.vector_store %arg8[%c0, %c0_0], %0 {strides = array<i32>} : memref<4x362xf32, #tpu.memory_space<vmem>>, vector<4x362xf32>,
    %c0_1 = arith.constant 0 : index
    %c0_2 = arith.constant 0 : index
    %c0_3 = arith.constant 0 : index
    %2 = vector.load %arg1[%c0_1, %c0_2, %c0_3] : memref<1x4x256xf32, #tpu.memory_space<vmem>>, vector<1x4x16xf32>
    %3 = vector.shape_cast %2 : vector<1x4x16xf32> to vector<4x16xf32>
    %c0_4 = arith.constant 0 : index
    %c38 = arith.constant 38 : index
    %4 = vector.load %arg8[%c0_4, %c38] : memref<4x362xf32, #tpu.memory_space<vmem>>, vector<4x16xf32>
    tpu.vector_store %arg8[%c0_4, %c38], %3 {strides = array<i32>} : memref<4x362xf32, #tpu.memory_space<vmem>>, vector<4x16xf32>,
    %c0_5 = arith.constant 0 : index
    %c0_6 = arith.constant 0 : index
    %c16 = arith.constant 16 : index
    %5 = vector.load %arg1[%c0_5, %c0_6, %c16] : memref<1x4x256xf32, #tpu.memory_space<vmem>>, vector<1x4x16xf32>
    %6 = vector.shape_cast %5 : vector<1x4x16xf32> to vector<4x16xf32>
    %c0_7 = arith.constant 0 : index
    %c56 = arith.constant 56 : index
    %7 = vector.load %arg8[%c0_7, %c56] : memref<4x362xf32, #tpu.memory_space<vmem>>, vector<4x16xf32>
    tpu.vector_store %arg8[%c0_7, %c56], %6 {strides = array<i32>} : memref<4x362xf32, #tpu.memory_space<vmem>>, vector<4x16xf32>,
    %c0_8 = arith.constant 0 : index
    %c0_9 = arith.constant 0 : index
    %c32 = arith.constant 32 : index
    %8 = vector.load %arg1[%c0_8, %c0_9, %c32] : memref<1x4x256xf32, #tpu.memory_space<vmem>>, vector<1x4x16xf32>
    %9 = vector.shape_cast %8 : vector<1x4x16xf32> to vector<4x16xf32>
    %c0_10 = arith.constant 0 : index
    %c74 = arith.constant 74 : index
    %10 = vector.load %arg8[%c0_10, %c74] : memref<4x362xf32, #tpu.memory_space<vmem>>, vector<4x16xf32>
    tpu.vector_store %arg8[%c0_10, %c74], %9 {strides = array<i32>} : memref<4x362xf32, #tpu.memory_space<vmem>>, vector<4x16xf32>,
    %c0_11 = arith.constant 0 : index
    %c0_12 = arith.constant 0 : index
    %c48 = arith.constant 48 : index
    %11 = vector.load %arg1[%c0_11, %c0_12, %c48] : memref<1x4x256xf32, #tpu.memory_space<vmem>>, vector<1x4x16xf32>
    %12 = vector.shape_cast %11 : vector<1x4x16xf32> to vector<4x16xf32>
    %c0_13 = arith.constant 0 : index
    %c92 = arith.constant 92 : index
    %13 = vector.load %arg8[%c0_13, %c92] : memref<4x362xf32, #tpu.memory_space<vmem>>, vector<4x16xf32>
    tpu.vector_store %arg8[%c0_13, %c92], %12 {strides = array<i32>} : memref<4x362xf32, #tpu.memory_space<vmem>>, vector<4x16xf32>,
    %c0_14 = arith.constant 0 : index
    %c0_15 = arith.constant 0 : index
    %c64 = arith.constant 64 : index
    %14 = vector.load %arg1[%c0_14, %c0_15, %c64] : memref<1x4x256xf32, #tpu.memory_space<vmem>>, vector<1x4x16xf32>
    %15 = vector.shape_cast %14 : vector<1x4x16xf32> to vector<4x16xf32>
    %c0_16 = arith.constant 0 : index
    %c110 = arith.constant 110 : index
    %16 = vector.load %arg8[%c0_16, %c110] : memref<4x362xf32, #tpu.memory_space<vmem>>, vector<4x16xf32>
    tpu.vector_store %arg8[%c0_16, %c110], %15 {strides = array<i32>} : memref<4x362xf32, #tpu.memory_space<vmem>>, vector<4x16xf32>,
    %c0_17 = arith.constant 0 : index
    %c0_18 = arith.constant 0 : index
    %c80 = arith.constant 80 : index
    %17 = vector.load %arg1[%c0_17, %c0_18, %c80] : memref<1x4x256xf32, #tpu.memory_space<vmem>>, vector<1x4x16xf32>
    %18 = vector.shape_cast %17 : vector<1x4x16xf32> to vector<4x16xf32>
    %c0_19 = arith.constant 0 : index
    %c128 = arith.constant 128 : index
    %19 = vector.load %arg8[%c0_19, %c128] : memref<4x362xf32, #tpu.memory_space<vmem>>, vector<4x16xf32>
    tpu.vector_store %arg8[%c0_19, %c128], %18 {strides = array<i32>} : memref<4x362xf32, #tpu.memory_space<vmem>>, vector<4x16xf32>,
    %c0_20 = arith.constant 0 : index
    %c0_21 = arith.constant 0 : index
    %c96 = arith.constant 96 : index
    %20 = vector.load %arg1[%c0_20, %c0_21, %c96] : memref<1x4x256xf32, #tpu.memory_space<vmem>>, vector<1x4x16xf32>
    %21 = vector.shape_cast %20 : vector<1x4x16xf32> to vector<4x16xf32>
    %c0_22 = arith.constant 0 : index
    %c146 = arith.constant 146 : index
    %22 = vector.load %arg8[%c0_22, %c146] : memref<4x362xf32, #tpu.memory_space<vmem>>, vector<4x16xf32>
    tpu.vector_store %arg8[%c0_22, %c146], %21 {strides = array<i32>} : memref<4x362xf32, #tpu.memory_space<vmem>>, vector<4x16xf32>,
    %c0_23 = arith.constant 0 : index
    %c0_24 = arith.constant 0 : index
    %c112 = arith.constant 112 : index
    %23 = vector.load %arg1[%c0_23, %c0_24, %c112] : memref<1x4x256xf32, #tpu.memory_space<vmem>>, vector<1x4x16xf32>
    %24 = vector.shape_cast %23 : vector<1x4x16xf32> to vector<4x16xf32>
    %c0_25 = arith.constant 0 : index
    %c164 = arith.constant 164 : index
    %25 = vector.load %arg8[%c0_25, %c164] : memref<4x362xf32, #tpu.memory_space<vmem>>, vector<4x16xf32>
    tpu.vector_store %arg8[%c0_25, %c164], %24 {strides = array<i32>} : memref<4x362xf32, #tpu.memory_space<vmem>>, vector<4x16xf32>,
    %c0_26 = arith.constant 0 : index
    %c0_27 = arith.constant 0 : index
    %c128_28 = arith.constant 128 : index
    %26 = vector.load %arg1[%c0_26, %c0_27, %c128_28] : memref<1x4x256xf32, #tpu.memory_space<vmem>>, vector<1x4x16xf32>
    %27 = vector.shape_cast %26 : vector<1x4x16xf32> to vector<4x16xf32>
    %c0_29 = arith.constant 0 : index
    %c182 = arith.constant 182 : index
    %28 = vector.load %arg8[%c0_29, %c182] : memref<4x362xf32, #tpu.memory_space<vmem>>, vector<4x16xf32>
    tpu.vector_store %arg8[%c0_29, %c182], %27 {strides = array<i32>} : memref<4x362xf32, #tpu.memory_space<vmem>>, vector<4x16xf32>,
    %c0_30 = arith.constant 0 : index
    %c0_31 = arith.constant 0 : index
    %c144 = arith.constant 144 : index
    %29 = vector.load %arg1[%c0_30, %c0_31, %c144] : memref<1x4x256xf32, #tpu.memory_space<vmem>>, vector<1x4x16xf32>
    %30 = vector.shape_cast %29 : vector<1x4x16xf32> to vector<4x16xf32>
    %c0_32 = arith.constant 0 : index
    %c200 = arith.constant 200 : index
    %31 = vector.load %arg8[%c0_32, %c200] : memref<4x362xf32, #tpu.memory_space<vmem>>, vector<4x16xf32>
    tpu.vector_store %arg8[%c0_32, %c200], %30 {strides = array<i32>} : memref<4x362xf32, #tpu.memory_space<vmem>>, vector<4x16xf32>,
    %c0_33 = arith.constant 0 : index
    %c0_34 = arith.constant 0 : index
    %c160 = arith.constant 160 : index
    %32 = vector.load %arg1[%c0_33, %c0_34, %c160] : memref<1x4x256xf32, #tpu.memory_space<vmem>>, vector<1x4x16xf32>
    %33 = vector.shape_cast %32 : vector<1x4x16xf32> to vector<4x16xf32>
    %c0_35 = arith.constant 0 : index
    %c218 = arith.constant 218 : index
    %34 = vector.load %arg8[%c0_35, %c218] : memref<4x362xf32, #tpu.memory_space<vmem>>, vector<4x16xf32>
    tpu.vector_store %arg8[%c0_35, %c218], %33 {strides = array<i32>} : memref<4x362xf32, #tpu.memory_space<vmem>>, vector<4x16xf32>,
    %c0_36 = arith.constant 0 : index
    %c0_37 = arith.constant 0 : index
    %c176 = arith.constant 176 : index
    %35 = vector.load %arg1[%c0_36, %c0_37, %c176] : memref<1x4x256xf32, #tpu.memory_space<vmem>>, vector<1x4x16xf32>
    %36 = vector.shape_cast %35 : vector<1x4x16xf32> to vector<4x16xf32>
    %c0_38 = arith.constant 0 : index
    %c236 = arith.constant 236 : index
    %37 = vector.load %arg8[%c0_38, %c236] : memref<4x362xf32, #tpu.memory_space<vmem>>, vector<4x16xf32>
    tpu.vector_store %arg8[%c0_38, %c236], %36 {strides = array<i32>} : memref<4x362xf32, #tpu.memory_space<vmem>>, vector<4x16xf32>,
    %c0_39 = arith.constant 0 : index
    %c0_40 = arith.constant 0 : index
    %c192 = arith.constant 192 : index
    %38 = vector.load %arg1[%c0_39, %c0_40, %c192] : memref<1x4x256xf32, #tpu.memory_space<vmem>>, vector<1x4x16xf32>
    %39 = vector.shape_cast %38 : vector<1x4x16xf32> to vector<4x16xf32>
    %c0_41 = arith.constant 0 : index
    %c254 = arith.constant 254 : index
    %40 = vector.load %arg8[%c0_41, %c254] : memref<4x362xf32, #tpu.memory_space<vmem>>, vector<4x16xf32>
    tpu.vector_store %arg8[%c0_41, %c254], %39 {strides = array<i32>} : memref<4x362xf32, #tpu.memory_space<vmem>>, vector<4x16xf32>,
    %c0_42 = arith.constant 0 : index
    %c0_43 = arith.constant 0 : index
    %c208 = arith.constant 208 : index
    %41 = vector.load %arg1[%c0_42, %c0_43, %c208] : memref<1x4x256xf32, #tpu.memory_space<vmem>>, vector<1x4x16xf32>
    %42 = vector.shape_cast %41 : vector<1x4x16xf32> to vector<4x16xf32>
    %c0_44 = arith.constant 0 : index
    %c272 = arith.constant 272 : index
    %43 = vector.load %arg8[%c0_44, %c272] : memref<4x362xf32, #tpu.memory_space<vmem>>, vector<4x16xf32>
    tpu.vector_store %arg8[%c0_44, %c272], %42 {strides = array<i32>} : memref<4x362xf32, #tpu.memory_space<vmem>>, vector<4x16xf32>,
    %c0_45 = arith.constant 0 : index
    %c0_46 = arith.constant 0 : index
    %c224 = arith.constant 224 : index
    %44 = vector.load %arg1[%c0_45, %c0_46, %c224] : memref<1x4x256xf32, #tpu.memory_space<vmem>>, vector<1x4x16xf32>
    %45 = vector.shape_cast %44 : vector<1x4x16xf32> to vector<4x16xf32>
    %c0_47 = arith.constant 0 : index
    %c290 = arith.constant 290 : index
    %46 = vector.load %arg8[%c0_47, %c290] : memref<4x362xf32, #tpu.memory_space<vmem>>, vector<4x16xf32>
    tpu.vector_store %arg8[%c0_47, %c290], %45 {strides = array<i32>} : memref<4x362xf32, #tpu.memory_space<vmem>>, vector<4x16xf32>,
    %c0_48 = arith.constant 0 : index
    %c0_49 = arith.constant 0 : index
    %c240 = arith.constant 240 : index
    %47 = vector.load %arg1[%c0_48, %c0_49, %c240] : memref<1x4x256xf32, #tpu.memory_space<vmem>>, vector<1x4x16xf32>
    %48 = vector.shape_cast %47 : vector<1x4x16xf32> to vector<4x16xf32>
    %c0_50 = arith.constant 0 : index
    %c308 = arith.constant 308 : index
    %49 = vector.load %arg8[%c0_50, %c308] : memref<4x362xf32, #tpu.memory_space<vmem>>, vector<4x16xf32>
    tpu.vector_store %arg8[%c0_50, %c308], %48 {strides = array<i32>} : memref<4x362xf32, #tpu.memory_space<vmem>>, vector<4x16xf32>,
    %c0_51 = arith.constant 0 : index
    %c0_52 = arith.constant 0 : index
    %50 = vector.load %arg8[%c0_51, %c0_52] : memref<4x362xf32, #tpu.memory_space<vmem>>, vector<4x324xf32>
    %c0_53 = arith.constant 0 : index
    %c0_54 = arith.constant 0 : index
    %51 = vector.load %arg10[%c0_53, %c0_54] : memref<76x324xf32, #tpu.memory_space<vmem>>, vector<4x324xf32>
    tpu.vector_store %arg10[%c0_53, %c0_54], %50 {strides = array<i32>} : memref<76x324xf32, #tpu.memory_space<vmem>>, vector<4x324xf32>,
    %c0_55 = arith.constant 0 : index
    %c1 = arith.constant 1 : index
    %52 = vector.load %arg8[%c0_55, %c1] : memref<4x362xf32, #tpu.memory_space<vmem>>, vector<4x324xf32>
    %c4 = arith.constant 4 : index
    %c0_56 = arith.constant 0 : index
    %53 = vector.load %arg10[%c4, %c0_56] : memref<76x324xf32, #tpu.memory_space<vmem>>, vector<4x324xf32>
    tpu.vector_store %arg10[%c4, %c0_56], %52 {strides = array<i32>} : memref<76x324xf32, #tpu.memory_space<vmem>>, vector<4x324xf32>,
    %c0_57 = arith.constant 0 : index
    %c2 = arith.constant 2 : index
    %54 = vector.load %arg8[%c0_57, %c2] : memref<4x362xf32, #tpu.memory_space<vmem>>, vector<4x324xf32>
    %c8 = arith.constant 8 : index
    %c0_58 = arith.constant 0 : index
    %55 = vector.load %arg10[%c8, %c0_58] : memref<76x324xf32, #tpu.memory_space<vmem>>, vector<4x324xf32>
    tpu.vector_store %arg10[%c8, %c0_58], %54 {strides = array<i32>} : memref<76x324xf32, #tpu.memory_space<vmem>>, vector<4x324xf32>,
    %c0_59 = arith.constant 0 : index
    %c18 = arith.constant 18 : index
    %56 = vector.load %arg8[%c0_59, %c18] : memref<4x362xf32, #tpu.memory_space<vmem>>, vector<4x324xf32>
    %c12 = arith.constant 12 : index
    %c0_60 = arith.constant 0 : index
    %57 = vector.load %arg10[%c12, %c0_60] : memref<76x324xf32, #tpu.memory_space<vmem>>, vector<4x324xf32>
    tpu.vector_store %arg10[%c12, %c0_60], %56 {strides = array<i32>} : memref<76x324xf32, #tpu.memory_space<vmem>>, vector<4x324xf32>,
    %c0_61 = arith.constant 0 : index
    %c19 = arith.constant 19 : index
    %58 = vector.load %arg8[%c0_61, %c19] : memref<4x362xf32, #tpu.memory_space<vmem>>, vector<4x324xf32>
    %c16_62 = arith.constant 16 : index
    %c0_63 = arith.constant 0 : index
    %59 = vector.load %arg10[%c16_62, %c0_63] : memref<76x324xf32, #tpu.memory_space<vmem>>, vector<4x324xf32>
    tpu.vector_store %arg10[%c16_62, %c0_63], %58 {strides = array<i32>} : memref<76x324xf32, #tpu.memory_space<vmem>>, vector<4x324xf32>,
    %c0_64 = arith.constant 0 : index
    %c20 = arith.constant 20 : index
    %60 = vector.load %arg8[%c0_64, %c20] : memref<4x362xf32, #tpu.memory_space<vmem>>, vector<4x324xf32>
    %c20_65 = arith.constant 20 : index
    %c0_66 = arith.constant 0 : index
    %61 = vector.load %arg10[%c20_65, %c0_66] : memref<76x324xf32, #tpu.memory_space<vmem>>, vector<4x324xf32>
    tpu.vector_store %arg10[%c20_65, %c0_66], %60 {strides = array<i32>} : memref<76x324xf32, #tpu.memory_space<vmem>>, vector<4x324xf32>,
    %c0_67 = arith.constant 0 : index
    %c36 = arith.constant 36 : index
    %62 = vector.load %arg8[%c0_67, %c36] : memref<4x362xf32, #tpu.memory_space<vmem>>, vector<4x324xf32>
    %c24 = arith.constant 24 : index
    %c0_68 = arith.constant 0 : index
    %63 = vector.load %arg10[%c24, %c0_68] : memref<76x324xf32, #tpu.memory_space<vmem>>, vector<4x324xf32>
    tpu.vector_store %arg10[%c24, %c0_68], %62 {strides = array<i32>} : memref<76x324xf32, #tpu.memory_space<vmem>>, vector<4x324xf32>,
    %c0_69 = arith.constant 0 : index
    %c37 = arith.constant 37 : index
    %64 = vector.load %arg8[%c0_69, %c37] : memref<4x362xf32, #tpu.memory_space<vmem>>, vector<4x324xf32>
    %c28 = arith.constant 28 : index
    %c0_70 = arith.constant 0 : index
    %65 = vector.load %arg10[%c28, %c0_70] : memref<76x324xf32, #tpu.memory_space<vmem>>, vector<4x324xf32>
    tpu.vector_store %arg10[%c28, %c0_70], %64 {strides = array<i32>} : memref<76x324xf32, #tpu.memory_space<vmem>>, vector<4x324xf32>,
    %c0_71 = arith.constant 0 : index
    %c38_72 = arith.constant 38 : index
    %66 = vector.load %arg8[%c0_71, %c38_72] : memref<4x362xf32, #tpu.memory_space<vmem>>, vector<4x324xf32>
    %c32_73 = arith.constant 32 : index
    %c0_74 = arith.constant 0 : index
    %67 = vector.load %arg10[%c32_73, %c0_74] : memref<76x324xf32, #tpu.memory_space<vmem>>, vector<4x324xf32>
    tpu.vector_store %arg10[%c32_73, %c0_74], %66 {strides = array<i32>} : memref<76x324xf32, #tpu.memory_space<vmem>>, vector<4x324xf32>,
    %c0_75 = arith.constant 0 : index
    %c0_76 = arith.constant 0 : index
    %68 = vector.load %arg2[%c0_75, %c0_76] : memref<8x36xf32, #tpu.memory_space<vmem>>, vector<8x36xf32>
    %c0_77 = arith.constant 0 : index
    %c0_78 = arith.constant 0 : index
    %69 = vector.load %arg10[%c0_77, %c0_78] : memref<76x324xf32, #tpu.memory_space<vmem>>, vector<36x324xf32>
    %cst_79 = arith.constant dense<0.000000e+00> : vector<8x324xf32>
    %70 = tpu.matmul %68, %69, %cst_79 {dimension_numbers = #tpu.dot_dimension_numbers<[1], [0], [0], [1], [0, 0, 1, 1], [], []>} : vector<8x36xf32>, vector<36x324xf32>, vector<8x324xf32> -> vector<8x324xf32>
    %c0_80 = arith.constant 0 : index
    %c0_81 = arith.constant 0 : index
    %71 = vector.load %arg4[%c0_80, %c0_81] : memref<8x2xf32, #tpu.memory_space<vmem>>, vector<8x1xf32>
    %72 = vector.broadcast %71 : vector<8x1xf32> to vector<8x324xf32>
    %73 = arith.addf %70, %72 : vector<8x324xf32>
    %c0_82 = arith.constant 0 : index
    %c0_83 = arith.constant 0 : index
    %74 = vector.load %arg5[%c0_82, %c0_83] : memref<1x324xf32, #tpu.memory_space<vmem>>, vector<1x324xf32>
    %75 = vector.broadcast %74 : vector<1x324xf32> to vector<8x324xf32>
    %76 = arith.mulf %73, %75 : vector<8x324xf32>
    %cst_84 = arith.constant 2.000000e-01 : f32
    %77 = vector.broadcast %cst_84 : f32 to vector<8x324xf32>
    %78 = arith.mulf %77, %76 : vector<8x324xf32>
    %79 = arith.maximumf %76, %78 : vector<8x324xf32>
    %c0_85 = arith.constant 0 : index
    %c19_86 = arith.constant 19 : index
    %80 = vector.load %arg9[%c0_85, %c19_86] : memref<8x362xf32, #tpu.memory_space<vmem>>, vector<8x324xf32>
    tpu.vector_store %arg9[%c0_85, %c19_86], %79 {strides = array<i32>} : memref<8x362xf32, #tpu.memory_space<vmem>>, vector<8x324xf32>,
    %c0_87 = arith.constant 0 : index
    %c0_88 = arith.constant 0 : index
    %81 = vector.load %arg9[%c0_87, %c0_88] : memref<8x362xf32, #tpu.memory_space<vmem>>, vector<8x324xf32>
    %c0_89 = arith.constant 0 : index
    %c0_90 = arith.constant 0 : index
    %82 = vector.load %arg10[%c0_89, %c0_90] : memref<76x324xf32, #tpu.memory_space<vmem>>, vector<8x324xf32>
    tpu.vector_store %arg10[%c0_89, %c0_90], %81 {strides = array<i32>} : memref<76x324xf32, #tpu.memory_space<vmem>>, vector<8x324xf32>,
    %c0_91 = arith.constant 0 : index
    %c1_92 = arith.constant 1 : index
    %83 = vector.load %arg9[%c0_91, %c1_92] : memref<8x362xf32, #tpu.memory_space<vmem>>, vector<8x324xf32>
    %c8_93 = arith.constant 8 : index
    %c0_94 = arith.constant 0 : index
    %84 = vector.load %arg10[%c8_93, %c0_94] : memref<76x324xf32, #tpu.memory_space<vmem>>, vector<8x324xf32>
    tpu.vector_store %arg10[%c8_93, %c0_94], %83 {strides = array<i32>} : memref<76x324xf32, #tpu.memory_space<vmem>>, vector<8x324xf32>,
    %c0_95 = arith.constant 0 : index
    %c2_96 = arith.constant 2 : index
    %85 = vector.load %arg9[%c0_95, %c2_96] : memref<8x362xf32, #tpu.memory_space<vmem>>, vector<8x324xf32>
    %c16_97 = arith.constant 16 : index
    %c0_98 = arith.constant 0 : index
    %86 = vector.load %arg10[%c16_97, %c0_98] : memref<76x324xf32, #tpu.memory_space<vmem>>, vector<8x324xf32>
    tpu.vector_store %arg10[%c16_97, %c0_98], %85 {strides = array<i32>} : memref<76x324xf32, #tpu.memory_space<vmem>>, vector<8x324xf32>,
    %c0_99 = arith.constant 0 : index
    %c18_100 = arith.constant 18 : index
    %87 = vector.load %arg9[%c0_99, %c18_100] : memref<8x362xf32, #tpu.memory_space<vmem>>, vector<8x324xf32>
    %c24_101 = arith.constant 24 : index
    %c0_102 = arith.constant 0 : index
    %88 = vector.load %arg10[%c24_101, %c0_102] : memref<76x324xf32, #tpu.memory_space<vmem>>, vector<8x324xf32>
    tpu.vector_store %arg10[%c24_101, %c0_102], %87 {strides = array<i32>} : memref<76x324xf32, #tpu.memory_space<vmem>>, vector<8x324xf32>,
    %c0_103 = arith.constant 0 : index
    %c19_104 = arith.constant 19 : index
    %89 = vector.load %arg9[%c0_103, %c19_104] : memref<8x362xf32, #tpu.memory_space<vmem>>, vector<8x324xf32>
    %c32_105 = arith.constant 32 : index
    %c0_106 = arith.constant 0 : index
    %90 = vector.load %arg10[%c32_105, %c0_106] : memref<76x324xf32, #tpu.memory_space<vmem>>, vector<8x324xf32>
    tpu.vector_store %arg10[%c32_105, %c0_106], %89 {strides = array<i32>} : memref<76x324xf32, #tpu.memory_space<vmem>>, vector<8x324xf32>,
    %c0_107 = arith.constant 0 : index
    %c20_108 = arith.constant 20 : index
    %91 = vector.load %arg9[%c0_107, %c20_108] : memref<8x362xf32, #tpu.memory_space<vmem>>, vector<8x324xf32>
    %c40 = arith.constant 40 : index
    %c0_109 = arith.constant 0 : index
    %92 = vector.load %arg10[%c40, %c0_109] : memref<76x324xf32, #tpu.memory_space<vmem>>, vector<8x324xf32>
    tpu.vector_store %arg10[%c40, %c0_109], %91 {strides = array<i32>} : memref<76x324xf32, #tpu.memory_space<vmem>>, vector<8x324xf32>,
    %c0_110 = arith.constant 0 : index
    %c36_111 = arith.constant 36 : index
    %93 = vector.load %arg9[%c0_110, %c36_111] : memref<8x362xf32, #tpu.memory_space<vmem>>, vector<8x324xf32>
    %c48_112 = arith.constant 48 : index
    %c0_113 = arith.constant 0 : index
    %94 = vector.load %arg10[%c48_112, %c0_113] : memref<76x324xf32, #tpu.memory_space<vmem>>, vector<8x324xf32>
    tpu.vector_store %arg10[%c48_112, %c0_113], %93 {strides = array<i32>} : memref<76x324xf32, #tpu.memory_space<vmem>>, vector<8x324xf32>,
    %c0_114 = arith.constant 0 : index
    %c37_115 = arith.constant 37 : index
    %95 = vector.load %arg9[%c0_114, %c37_115] : memref<8x362xf32, #tpu.memory_space<vmem>>, vector<8x324xf32>
    %c56_116 = arith.constant 56 : index
    %c0_117 = arith.constant 0 : index
    %96 = vector.load %arg10[%c56_116, %c0_117] : memref<76x324xf32, #tpu.memory_space<vmem>>, vector<8x324xf32>
    tpu.vector_store %arg10[%c56_116, %c0_117], %95 {strides = array<i32>} : memref<76x324xf32, #tpu.memory_space<vmem>>, vector<8x324xf32>,
    %c0_118 = arith.constant 0 : index
    %c38_119 = arith.constant 38 : index
    %97 = vector.load %arg9[%c0_118, %c38_119] : memref<8x362xf32, #tpu.memory_space<vmem>>, vector<8x324xf32>
    %c64_120 = arith.constant 64 : index
    %c0_121 = arith.constant 0 : index
    %98 = vector.load %arg10[%c64_120, %c0_121] : memref<76x324xf32, #tpu.memory_space<vmem>>, vector<8x324xf32>
    tpu.vector_store %arg10[%c64_120, %c0_121], %97 {strides = array<i32>} : memref<76x324xf32, #tpu.memory_space<vmem>>, vector<8x324xf32>,
    %c0_122 = arith.constant 0 : index
    %c19_123 = arith.constant 19 : index
    %99 = vector.load %arg8[%c0_122, %c19_123] : memref<4x362xf32, #tpu.memory_space<vmem>>, vector<4x324xf32>
    %c72 = arith.constant 72 : index
    %c0_124 = arith.constant 0 : index
    %100 = vector.load %arg10[%c72, %c0_124] : memref<76x324xf32, #tpu.memory_space<vmem>>, vector<4x324xf32>
    tpu.vector_store %arg10[%c72, %c0_124], %99 {strides = array<i32>} : memref<76x324xf32, #tpu.memory_space<vmem>>, vector<4x324xf32>,
    %c0_125 = arith.constant 0 : index
    %c0_126 = arith.constant 0 : index
    %101 = vector.load %arg3[%c0_125, %c0_126] : memref<8x76xf32, #tpu.memory_space<vmem>>, vector<8x76xf32>
    %c0_127 = arith.constant 0 : index
    %c0_128 = arith.constant 0 : index
    %102 = vector.load %arg10[%c0_127, %c0_128] : memref<76x324xf32, #tpu.memory_space<vmem>>, vector<76x324xf32>
    %cst_129 = arith.constant dense<0.000000e+00> : vector<8x324xf32>
    %103 = tpu.matmul %101, %102, %cst_129 {dimension_numbers = #tpu.dot_dimension_numbers<[1], [0], [0], [1], [0, 0, 1, 1], [], []>} : vector<8x76xf32>, vector<76x324xf32>, vector<8x324xf32> -> vector<8x324xf32>
    %c0_130 = arith.constant 0 : index
    %c1_131 = arith.constant 1 : index
    %104 = vector.load %arg4[%c0_130, %c1_131] : memref<8x2xf32, #tpu.memory_space<vmem>>, vector<8x1xf32>
    %105 = vector.broadcast %104 : vector<8x1xf32> to vector<8x324xf32>
    %106 = arith.addf %103, %105 : vector<8x324xf32>
    %107 = vector.extract_strided_slice %106 {offsets = [0, 19], sizes = [8, 16], strides = [1, 1]} : vector<8x324xf32> to vector<8x16xf32>
    %c0_132 = arith.constant 0 : index
    %c0_133 = arith.constant 0 : index
    %108 = vector.load %arg11[%c0_132, %c0_133] : memref<64x16xf32, #tpu.memory_space<vmem>>, vector<8x16xf32>
    tpu.vector_store %arg11[%c0_132, %c0_133], %107 {strides = array<i32>} : memref<64x16xf32, #tpu.memory_space<vmem>>, vector<8x16xf32>,
    %109 = vector.extract_strided_slice %106 {offsets = [0, 55], sizes = [8, 16], strides = [1, 1]} : vector<8x324xf32> to vector<8x16xf32>
    %c8_134 = arith.constant 8 : index
    %c0_135 = arith.constant 0 : index
    %110 = vector.load %arg11[%c8_134, %c0_135] : memref<64x16xf32, #tpu.memory_space<vmem>>, vector<8x16xf32>
    tpu.vector_store %arg11[%c8_134, %c0_135], %109 {strides = array<i32>} : memref<64x16xf32, #tpu.memory_space<vmem>>, vector<8x16xf32>,
    %111 = vector.extract_strided_slice %106 {offsets = [0, 91], sizes = [8, 16], strides = [1, 1]} : vector<8x324xf32> to vector<8x16xf32>
    %c16_136 = arith.constant 16 : index
    %c0_137 = arith.constant 0 : index
    %112 = vector.load %arg11[%c16_136, %c0_137] : memref<64x16xf32, #tpu.memory_space<vmem>>, vector<8x16xf32>
    tpu.vector_store %arg11[%c16_136, %c0_137], %111 {strides = array<i32>} : memref<64x16xf32, #tpu.memory_space<vmem>>, vector<8x16xf32>,
    %113 = vector.extract_strided_slice %106 {offsets = [0, 127], sizes = [8, 16], strides = [1, 1]} : vector<8x324xf32> to vector<8x16xf32>
    %c24_138 = arith.constant 24 : index
    %c0_139 = arith.constant 0 : index
    %114 = vector.load %arg11[%c24_138, %c0_139] : memref<64x16xf32, #tpu.memory_space<vmem>>, vector<8x16xf32>
    tpu.vector_store %arg11[%c24_138, %c0_139], %113 {strides = array<i32>} : memref<64x16xf32, #tpu.memory_space<vmem>>, vector<8x16xf32>,
    %115 = vector.extract_strided_slice %106 {offsets = [0, 163], sizes = [8, 16], strides = [1, 1]} : vector<8x324xf32> to vector<8x16xf32>
    %c32_140 = arith.constant 32 : index
    %c0_141 = arith.constant 0 : index
    %116 = vector.load %arg11[%c32_140, %c0_141] : memref<64x16xf32, #tpu.memory_space<vmem>>, vector<8x16xf32>
    tpu.vector_store %arg11[%c32_140, %c0_141], %115 {strides = array<i32>} : memref<64x16xf32, #tpu.memory_space<vmem>>, vector<8x16xf32>,
    %117 = vector.extract_strided_slice %106 {offsets = [0, 199], sizes = [8, 16], strides = [1, 1]} : vector<8x324xf32> to vector<8x16xf32>
    %c40_142 = arith.constant 40 : index
    %c0_143 = arith.constant 0 : index
    %118 = vector.load %arg11[%c40_142, %c0_143] : memref<64x16xf32, #tpu.memory_space<vmem>>, vector<8x16xf32>
    tpu.vector_store %arg11[%c40_142, %c0_143], %117 {strides = array<i32>} : memref<64x16xf32, #tpu.memory_space<vmem>>, vector<8x16xf32>,
    %119 = vector.extract_strided_slice %106 {offsets = [0, 235], sizes = [8, 16], strides = [1, 1]} : vector<8x324xf32> to vector<8x16xf32>
    %c48_144 = arith.constant 48 : index
    %c0_145 = arith.constant 0 : index
    %120 = vector.load %arg11[%c48_144, %c0_145] : memref<64x16xf32, #tpu.memory_space<vmem>>, vector<8x16xf32>
    tpu.vector_store %arg11[%c48_144, %c0_145], %119 {strides = array<i32>} : memref<64x16xf32, #tpu.memory_space<vmem>>, vector<8x16xf32>,
    %121 = vector.extract_strided_slice %106 {offsets = [0, 271], sizes = [8, 16], strides = [1, 1]} : vector<8x324xf32> to vector<8x16xf32>
    %c56_146 = arith.constant 56 : index
    %c0_147 = arith.constant 0 : index
    %122 = vector.load %arg11[%c56_146, %c0_147] : memref<64x16xf32, #tpu.memory_space<vmem>>, vector<8x16xf32>
    tpu.vector_store %arg11[%c56_146, %c0_147], %121 {strides = array<i32>} : memref<64x16xf32, #tpu.memory_space<vmem>>, vector<8x16xf32>,
    %c0_148 = arith.constant 0 : index
    %c0_149 = arith.constant 0 : index
    %123 = vector.load %arg11[%c0_148, %c0_149] : memref<64x16xf32, #tpu.memory_space<vmem>>, vector<64x16xf32>
    %c0_150 = arith.constant 0 : index
    %c0_151 = arith.constant 0 : index
    %124 = vector.load %arg6[%c0_150, %c0_151] : memref<16x8xf32, #tpu.memory_space<vmem>>, vector<16x8xf32>
    %cst_152 = arith.constant dense<0.000000e+00> : vector<64x8xf32>
    %125 = tpu.matmul %123, %124, %cst_152 {dimension_numbers = #tpu.dot_dimension_numbers<[1], [0], [0], [1], [0, 0, 1, 1], [], []>} : vector<64x16xf32>, vector<16x8xf32>, vector<64x8xf32> -> vector<64x8xf32>
    %126 = vector.extract_strided_slice %125 {offsets = [0, 0], sizes = [8, 8], strides = [1, 1]} : vector<64x8xf32> to vector<8x8xf32>
    %c0_153 = arith.constant 0 : index
    %c0_154 = arith.constant 0 : index
    %c0_155 = arith.constant 0 : index
    %127 = vector.load %arg7[%c0_153, %c0_154, %c0_155] : memref<1x8x64xf32, #tpu.memory_space<vmem>>, vector<1x8x8xf32>
    %128 = vector.shape_cast %127 : vector<1x8x8xf32> to vector<8x8xf32>
    %129 = vector.shape_cast %126 : vector<8x8xf32> to vector<1x8x8xf32>
    tpu.vector_store %arg7[%c0_153, %c0_154, %c0_155], %129 {strides = array<i32>} : memref<1x8x64xf32, #tpu.memory_space<vmem>>, vector<1x8x8xf32>,
    %130 = vector.extract_strided_slice %125 {offsets = [8, 0], sizes = [8, 8], strides = [1, 1]} : vector<64x8xf32> to vector<8x8xf32>
    %c0_156 = arith.constant 0 : index
    %c0_157 = arith.constant 0 : index
    %c8_158 = arith.constant 8 : index
    %131 = vector.load %arg7[%c0_156, %c0_157, %c8_158] : memref<1x8x64xf32, #tpu.memory_space<vmem>>, vector<1x8x8xf32>
    %132 = vector.shape_cast %131 : vector<1x8x8xf32> to vector<8x8xf32>
    %133 = vector.shape_cast %130 : vector<8x8xf32> to vector<1x8x8xf32>
    tpu.vector_store %arg7[%c0_156, %c0_157, %c8_158], %133 {strides = array<i32>} : memref<1x8x64xf32, #tpu.memory_space<vmem>>, vector<1x8x8xf32>,
    %134 = vector.extract_strided_slice %125 {offsets = [16, 0], sizes = [8, 8], strides = [1, 1]} : vector<64x8xf32> to vector<8x8xf32>
    %c0_159 = arith.constant 0 : index
    %c0_160 = arith.constant 0 : index
    %c16_161 = arith.constant 16 : index
    %135 = vector.load %arg7[%c0_159, %c0_160, %c16_161] : memref<1x8x64xf32, #tpu.memory_space<vmem>>, vector<1x8x8xf32>
    %136 = vector.shape_cast %135 : vector<1x8x8xf32> to vector<8x8xf32>
    %137 = vector.shape_cast %134 : vector<8x8xf32> to vector<1x8x8xf32>
    tpu.vector_store %arg7[%c0_159, %c0_160, %c16_161], %137 {strides = array<i32>} : memref<1x8x64xf32, #tpu.memory_space<vmem>>, vector<1x8x8xf32>,
    %138 = vector.extract_strided_slice %125 {offsets = [24, 0], sizes = [8, 8], strides = [1, 1]} : vector<64x8xf32> to vector<8x8xf32>
    %c0_162 = arith.constant 0 : index
    %c0_163 = arith.constant 0 : index
    %c24_164 = arith.constant 24 : index
    %139 = vector.load %arg7[%c0_162, %c0_163, %c24_164] : memref<1x8x64xf32, #tpu.memory_space<vmem>>, vector<1x8x8xf32>
    %140 = vector.shape_cast %139 : vector<1x8x8xf32> to vector<8x8xf32>
    %141 = vector.shape_cast %138 : vector<8x8xf32> to vector<1x8x8xf32>
    tpu.vector_store %arg7[%c0_162, %c0_163, %c24_164], %141 {strides = array<i32>} : memref<1x8x64xf32, #tpu.memory_space<vmem>>, vector<1x8x8xf32>,
    %142 = vector.extract_strided_slice %125 {offsets = [32, 0], sizes = [8, 8], strides = [1, 1]} : vector<64x8xf32> to vector<8x8xf32>
    %c0_165 = arith.constant 0 : index
    %c0_166 = arith.constant 0 : index
    %c32_167 = arith.constant 32 : index
    %143 = vector.load %arg7[%c0_165, %c0_166, %c32_167] : memref<1x8x64xf32, #tpu.memory_space<vmem>>, vector<1x8x8xf32>
    %144 = vector.shape_cast %143 : vector<1x8x8xf32> to vector<8x8xf32>
    %145 = vector.shape_cast %142 : vector<8x8xf32> to vector<1x8x8xf32>
    tpu.vector_store %arg7[%c0_165, %c0_166, %c32_167], %145 {strides = array<i32>} : memref<1x8x64xf32, #tpu.memory_space<vmem>>, vector<1x8x8xf32>,
    %146 = vector.extract_strided_slice %125 {offsets = [40, 0], sizes = [8, 8], strides = [1, 1]} : vector<64x8xf32> to vector<8x8xf32>
    %c0_168 = arith.constant 0 : index
    %c0_169 = arith.constant 0 : index
    %c40_170 = arith.constant 40 : index
    %147 = vector.load %arg7[%c0_168, %c0_169, %c40_170] : memref<1x8x64xf32, #tpu.memory_space<vmem>>, vector<1x8x8xf32>
    %148 = vector.shape_cast %147 : vector<1x8x8xf32> to vector<8x8xf32>
    %149 = vector.shape_cast %146 : vector<8x8xf32> to vector<1x8x8xf32>
    tpu.vector_store %arg7[%c0_168, %c0_169, %c40_170], %149 {strides = array<i32>} : memref<1x8x64xf32, #tpu.memory_space<vmem>>, vector<1x8x8xf32>,
    %150 = vector.extract_strided_slice %125 {offsets = [48, 0], sizes = [8, 8], strides = [1, 1]} : vector<64x8xf32> to vector<8x8xf32>
    %c0_171 = arith.constant 0 : index
    %c0_172 = arith.constant 0 : index
    %c48_173 = arith.constant 48 : index
    %151 = vector.load %arg7[%c0_171, %c0_172, %c48_173] : memref<1x8x64xf32, #tpu.memory_space<vmem>>, vector<1x8x8xf32>
    %152 = vector.shape_cast %151 : vector<1x8x8xf32> to vector<8x8xf32>
    %153 = vector.shape_cast %150 : vector<8x8xf32> to vector<1x8x8xf32>
    tpu.vector_store %arg7[%c0_171, %c0_172, %c48_173], %153 {strides = array<i32>} : memref<1x8x64xf32, #tpu.memory_space<vmem>>, vector<1x8x8xf32>,
    %154 = vector.extract_strided_slice %125 {offsets = [56, 0], sizes = [8, 8], strides = [1, 1]} : vector<64x8xf32> to vector<8x8xf32>
    %c0_174 = arith.constant 0 : index
    %c0_175 = arith.constant 0 : index
    %c56_176 = arith.constant 56 : index
    %155 = vector.load %arg7[%c0_174, %c0_175, %c56_176] : memref<1x8x64xf32, #tpu.memory_space<vmem>>, vector<1x8x8xf32>
    %156 = vector.shape_cast %155 : vector<1x8x8xf32> to vector<8x8xf32>
    %157 = vector.shape_cast %154 : vector<8x8xf32> to vector<1x8x8xf32>
    tpu.vector_store %arg7[%c0_174, %c0_175, %c56_176], %157 {strides = array<i32>} : memref<1x8x64xf32, #tpu.memory_space<vmem>>, vector<1x8x8xf32>,
    return
  }
  func.func @transform_0(%arg0: i32) -> (i32, i32, i32) {
    %c0_i32 = arith.constant 0 : i32
    %c0_i32_0 = arith.constant 0 : i32
    %c0_i32_1 = arith.constant 0 : i32
    return %arg0, %c0_i32, %c0_i32_0 : i32, i32, i32
  }
  func.func @transform_1(%arg0: i32) -> (i32, i32) {
    %c0_i32 = arith.constant 0 : i32
    %c0_i32_0 = arith.constant 0 : i32
    %c0_i32_1 = arith.constant 0 : i32
    return %c0_i32, %c0_i32_0 : i32, i32
  }
  func.func @transform_2(%arg0: i32) -> (i32, i32) {
    %c0_i32 = arith.constant 0 : i32
    %c0_i32_0 = arith.constant 0 : i32
    %c0_i32_1 = arith.constant 0 : i32
    return %c0_i32, %c0_i32_0 : i32, i32
  }
  func.func @transform_3(%arg0: i32) -> (i32, i32) {
    %c0_i32 = arith.constant 0 : i32
    %c0_i32_0 = arith.constant 0 : i32
    %c0_i32_1 = arith.constant 0 : i32
    return %c0_i32, %c0_i32_0 : i32, i32
  }
  func.func @transform_4(%arg0: i32) -> (i32, i32) {
    %c0_i32 = arith.constant 0 : i32
    %c0_i32_0 = arith.constant 0 : i32
    %c0_i32_1 = arith.constant 0 : i32
    return %c0_i32, %c0_i32_0 : i32, i32
  }
  func.func @transform_5(%arg0: i32) -> (i32, i32) {
    %c0_i32 = arith.constant 0 : i32
    %c0_i32_0 = arith.constant 0 : i32
    %c0_i32_1 = arith.constant 0 : i32
    return %c0_i32, %c0_i32_0 : i32, i32
  }
  func.func @transform_6(%arg0: i32) -> (i32, i32, i32) {
    %c0_i32 = arith.constant 0 : i32
    %c0_i32_0 = arith.constant 0 : i32
    %c0_i32_1 = arith.constant 0 : i32
    return %arg0, %c0_i32, %c0_i32_0 : i32, i32, i32
  }
}

</mosaic_0001>

<bundles_post_ra>
// kernel: tpu_custom_call.1
= control target key start
LH: loop header
LB: loop body
LE: loop exit
PB: predicated region body
PF: predicated region fallthrough
CT: control target
= control target key end

     0   :  { %11 = vsyncpa [#allocation7], 0  ;;  %s2223_s0 = inlined_call_operand.vmem [shape: f32[2,4,256], index: 0, kind: input, shape index: {}]   ;;  %s2224_s1 = inlined_call_operand.vmem [shape: f32[8,36], index: 1, kind: input, shape index: {}]   ;;  %s2225_s2 = inlined_call_operand.vmem [shape: f32[8,76], index: 2, kind: input, shape index: {}]   ;;  %s2226_s3 = inlined_call_operand.vmem [shape: f32[8,2], index: 3, kind: input, shape index: {}]   ;;  %s2227_s4 = inlined_call_operand.hbm [shape: f32[1,324], index: 4, kind: input, shape index: {}]   ;;  %s2228_s5 = inlined_call_operand.vmem [shape: f32[16,8], index: 5, kind: input, shape index: {}]   ;;  %s2229_s6 = inlined_call_operand.hbm [shape: f32[2,8,64], index: 6, kind: output, shape index: {}]  }
   0x1   :  { %12 = vsyncpa [#allocation8], 0 }
   0x2   :  { %14 = vsyncpa [#allocation8 + $0x1], 0  ;;  %s1847_s21 = smov 0   ;;  %s1849_s22 = smov 0  }
   0x3   :  { %s1851_s23 = smov 0   ;;  %s1853_s24 = smov 0  }
   0x4 LB: > { %s1868_s25 = sadd.s32 4294967295, %s1768_s24   ;;  %s1465_s26 = sadd.s32 4294967294, %s1768_s24   ;;  %s1768_s24 = sphi %s1853_s24, %s2236_s24   ;;  %s1764_s23 = sphi %s1851_s23, %s2235_s23   ;;  %s1760_s22 = sphi %s1849_s22, %s2234_s22   ;;  %s1756_s21 = sphi %s1847_s21, %s2233_s21  }
   0x5   : > { %s1872_s27 = sadd.s32 1, %s1768_s24   ;;  %s158_s28 = sadd.s32 1, %s1764_s23 }
   0x6   : > { %s155_s29 = ssub.s32 %s1768_s24, %s1872_s27  ;;  %p168_p0 = scmp.ne.s32.totalorder %s1764_s23, %s1760_s22 }
   0x7   : > { %p156_p1 = scmp.eq.s32.totalorder %s155_s29, 0  ;;  %p169_p2 = scmp.eq.s32.totalorder %s1868_s25, 1 }
   0x8   : > { %p174_p3 = scmp.ne.s32.totalorder %s1760_s22, %s1756_s21  ;;  %p175_p4 = scmp.eq.s32.totalorder %s1465_s26, 1 }
   0x9   : > { %s1883_s30 = scalar_select %p156_p1, %s1764_s23, %s158_s28  }
   0xa   : > { %p1885_p5 = por %p169_p2, %p168_p0  ;;  %p1889_p6 = por %p175_p4, %p174_p3 }
   0xb   : > { %p1466_p7 = scmp.ge.s32.totalorder %s1768_s24, 1  ;;  %p182_p8 = scmp.lt.s32.totalorder %s1768_s24, 3 }
   0xc   : > { %p1594_p9 = scmp.eq.s32.totalorder %s1868_s25, 0  ;;  %s1770_s10 = smov [#allocation6]  }
   0xd   : > { %p1896_p10 = pnand %p1466_p7, %p182_p8  ;;  %s204_s11 = sshll.u32 %s1770_s10, 4  ;;  %s205_s11 = int_to_ptr.vmem [resolvable:$true] %s204_s11 }
   0xe   : > { %s1689_s12 = scalar_lea.vmem %s205_s11, 48  ;;  %s1696_s13 = scalar_lea.vmem %s205_s11, 64 }
   0xf   : > { %p1586_p11 = pneg %p1896_p10  ;;  %p1690_p0 = scmp.ne.s32.totalorder %s205_s11, %s1689_s12 }
  0x10   : > { %p1697_p3 = scmp.lt.s32.totalorder %s205_s11, %s205_s11  ;;  %p1698_p4 = scmp.lt.s32.totalorder %s1696_s13, %s1689_s12 }
  0x11   : > { %p1587_p12 = pnand %p1594_p9, %p1586_p11 }
  0x12   : > { %p1699_p7 = por %p1698_p4, %p1697_p3 }
  0x13   : > { %p1680_p13 = pneg %p1587_p12 }
  0x15   : > { %p1692_p1 = pnand %p1690_p0, %p1680_p13 }
  0x17   : > { %p1693_p2 = pneg %p1692_p1 }
  0x19   : > { %p1700_p8 = pnand %p1699_p7, %p1693_p2 }
  0x1b   : > { %1703 = shalt.err (!%p1700_p8)
}
  0x1c   : > { %1589 = dma.hbm_to_vmem [thread:$0]  (!%p1587_p12), %s2227_s4, 48, %s205_s11, [#allocation7]  }
  0x1d   : > { %228 = sbr.rel (%p1896_p10) target bundleno = 1510 (0x5e6), region = 44 }
  0x22   : > { %1747 = dma.done.wait (%p1594_p9), [#allocation7], 48  }
  0x23   : > { %1749 = vsyncadd (%p1594_p9), [#allocation7], 4294967248  ;;  %p258_p11 = scmp.lt.s32.totalorder %s1868_s25, 1  ;;  %v1771_v0 = vmov 0.0   ;;  %s1772_s26 = smov 48   ;;  %vm264_vm0 = vcmask 863232  }
  0x24   : > { %263 = vst [vmem:[#allocation2] sm:$0xff] %v1771_v0  ;;  %1524 = vmatprep.subr.mxu1 %v1771_v0  ;;  %657 = vmatprep.mubr.f32.mxu0 %v1771_v0  ;;  %s1773_s28 = smov 52   ;;  %s1774_s29 = smov 50   ;;  %265 = vst.msk [vmem:[#allocation2 + $0x8] sm:$0xf] %vm264_vm0, %v1771_v0  ;;  %vm306_vm1 = vcmask 125952  }
  0x25   : > { %s259_s16 = scalar_select %p258_p11, %s1868_s25, 1  ;;  %vm313_vm2 = vcmask 273552   ;;  %vm320_vm3 = vcmask 421152   ;;  %vm327_vm4 = vcmask 568752   ;;  %vm271_vm5 = vcmask 437552   ;;  %v1995_v48 = vld [vmem:[%s2226_s3] sm:$0xff] }
  0x26   : > { %s1775_s9 = smov 54   ;;  %s1776_s10 = smov 38   ;;  %vm334_vm6 = vcmask 716352   ;;  %vm278_vm7 = vcmask 585152   ;;  %vm341_vm8 = vcmask 863952   ;;  %vm285_vm9 = vcmask 732752  }
  0x27   : > { %s1496_s17 = sshll.u32 %s259_s16, 3  ;;  %s1777_s11 = smov 56   ;;  %vm358_vm10 = vcmask 1044464   ;;  %vm359_vm11 = vcmask 113668   ;;  %vm355_vm12 = vcmask 506880   ;;  %vm348_vm13 = vcmask 1011552  }
  0x28   : > { %s1921_s20 = scalar_lea.vmem %s2223_s0, %s1496_s17  ;;  %s1778_s12 = smov 62   ;;  %vm292_vm14 = vcmask 880352   ;;  %vm360_vm15 = vmor %vm359_vm11, %vm358_vm10  ;;  %vm299_vm0 = vcmask 1027952   ;;  %v1797_v47 = vmov 0   ;;  %vm507_vm10 = vcmask 752640  }
  0x29   : > { %v301_v1 = vld [vmem:[%s1921_s20] sm:$0xf]  ;;  %v322_v4 = vld [vmem:[%s1921_s20 + $0x4] sm:$0xf]  ;;  %s1779_s13 = smov 40   ;;  %s1780_s14 = smov 58   ;;  %1670 = vset.pattern.permute.xlu0 %v1797_v47 }
  0x2a   : > { %v315_v2 = vld [vmem:[%s1921_s20] sm:$0xf]  ;;  %303 = vrot.lane.b32.xlu0 %v301_v1, %s1772_s26  ;;  %v329_v6 = vld [vmem:[%s1921_s20 + $0x4] sm:$0xf]  ;;  %s1781_s15 = smov 42   ;;  %s1782_s16 = smov 60  }
  0x2b   : > { %317 = vrot.lane.b32.xlu1 %v315_v2, %s1773_s28  ;;  %v308_v3 = vld [vmem:[%s1921_s20] sm:$0xf]  ;;  %v350_v7 = vld [vmem:[%s1921_s20 + $0x4] sm:$0xf]  ;;  %s1783_s17 = smov 44   ;;  %s1784_s18 = smov 46  }
  0x2c   : > { %v266_v5 = vld [vmem:[%s1921_s20] sm:$0xf]  ;;  %v336_v9 = vld [vmem:[%s1921_s20 + $0x4] sm:$0xf]  ;;  %s1785_s19 = smov 64   ;;  %s1786_s28 = smov 66  }
  0x2d   : > { %v273_v8 = vld [vmem:[%s1921_s20] sm:$0xf]  ;;  %v343_v11 = vld [vmem:[%s1921_s20 + $0x4] sm:$0xf]  ;;  %vm466_vm11 = vcmask 891904  }
  0x2e   : > { %310 = vrot.lane.b32.xlu0 %v308_v3, %s1774_s29  ;;  %v280_v10 = vld [vmem:[%s1921_s20] sm:$0xf]  ;;  %v362_v14 = vld [vmem:[%s1921_s20 + $0x4] sm:$0xf]  ;;  %s1787_s29 = smov 68  }
  0x2f   : > { %324 = vrot.lane.b32.xlu1 %v322_v4, %s1775_s9  ;;  %v287_v12 = vld [vmem:[%s1921_s20] sm:$0xf]  ;;  %v369_v15 = vld [vmem:[%s1921_s20 + $0x4] sm:$0xf]  ;;  %s1789_s9 = smov 91  }
  0x30   : > { %v294_v13 = vld [vmem:[%s1921_s20] sm:$0xf]  ;;  %v376_v16 = vld [vmem:[%s1921_s20 + $0x4] sm:$0xf]  ;;  %s1788_s20 = smov 90  }
  0x31   : > { %v734_v47 = vld [vmem:[#allocation6] sm:$0x7] }
  0x32   : > { %268 = vrot.lane.b32.xlu0 %v266_v5, %s1776_s10  ;;  %s1790_s10 = smov 92  }
  0x33   : > { %331 = vrot.lane.b32.xlu1 %v329_v6, %s1777_s11 }
  0x36   : > { %352 = vrot.lane.b32.xlu0 %v350_v7, %s1778_s12  ;;  %s1791_s12 = smov 108  }
  0x37   : > { %275 = vrot.lane.b32.xlu1 %v273_v8, %s1779_s13 }
  0x3a   : > { %338 = vrot.lane.b32.xlu0 %v336_v9, %s1780_s14  ;;  %s1792_s14 = smov 109  }
  0x3b   : > { %282 = vrot.lane.b32.xlu1 %v280_v10, %s1781_s15  ;;  %s1793_s15 = smov 110  }
  0x3e   : > { %345 = vrot.lane.b32.xlu0 %v343_v11, %s1782_s16  ;;  %s1794_s16 = smov 126  }
  0x3f   : > { %289 = vrot.lane.b32.xlu1 %v287_v12, %s1783_s17  ;;  %s1796_s17 = smov 127  }
  0x42   : > { %296 = vrot.lane.b32.xlu0 %v294_v13, %s1784_s18  ;;  %s1798_s18 = smov 19  }
  0x43   : > { %364 = vrot.lane.b32.xlu1 %v362_v14, %s1785_s19  ;;  %s1801_s19 = smov 1  }
  0x46   : > { %371 = vrot.lane.b32.xlu0 %v369_v15, %s1786_s28  ;;  %s1802_s28 = smov 73  }
  0x47   : > { %378 = vrot.lane.b32.xlu1 %v376_v16, %s1787_s29  ;;  %s1803_s29 = smov 57  }
  0x9c   : > { %v304_v17 = vpop.permute.xlu0 %303 }
  0x9d   : > { %v318_v18 = vpop.permute.xlu1 %317  ;;  %307 = vst.msk [vmem:[#allocation2 + $0x4] sm:$0xf] %vm306_vm1, %v304_v17  ;;  %vm367_vm1 = vcmask 257152  }
  0xa0   : > { %v311_v19 = vpop.permute.xlu0 %310 }
  0xa1   : > { %v325_v20 = vpop.permute.xlu1 %324  ;;  %314 = vst.msk [vmem:[#allocation2 + $0x4] sm:$0xf] %vm313_vm2, %v311_v19  ;;  %vm374_vm2 = vcmask 404752  }
  0xa2   : > { %321 = vst.msk [vmem:[#allocation2 + $0x4] sm:$0xf] %vm320_vm3, %v318_v18  ;;  %vm381_vm3 = vcmask 552352  }
  0xa3   : > { %328 = vst.msk [vmem:[#allocation2 + $0x4] sm:$0xf] %vm327_vm4, %v325_v20  ;;  %vm390_vm4 = vcmask 551936  }
  0xa4   : > { %v269_v21 = vpop.permute.xlu0 %268 }
  0xa5   : > { %v332_v22 = vpop.permute.xlu1 %331  ;;  %272 = vst.msk [vmem:[#allocation2] sm:$0xf] %vm271_vm5, %v269_v21  ;;  %vm1795_vm5 = vmmov 0  }
  0xa6   : > { %335 = vst.msk [vmem:[#allocation2 + $0x4] sm:$0xf] %vm334_vm6, %v332_v22  ;;  %1534 = vmatprep.mubr.msk.f32.mxu1 %vm1795_vm5, %v1771_v0  ;;  %vm548_vm6 = vcmask 736256  }
  0xa8   : > { %v353_v23 = vpop.permute.xlu0 %352 }
  0xa9   : > { %v276_v24 = vpop.permute.xlu1 %275  ;;  %v354_v27 = vrot.slane %v353_v23, 4 }
  0xaa   : > { %279 = vst.msk [vmem:[#allocation2] sm:$0xf] %vm278_vm7, %v276_v24  ;;  %vm528_vm7 = vcmask 744448  }
  0xab   : > { %v356_v30 = vsel %vm355_vm12, %v354_v27, %v353_v23  ;;  %vm425_vm12 = vcmask 1031168  }
  0xac   : > { %v339_v25 = vpop.permute.xlu0 %338 }
  0xad   : > { %v283_v26 = vpop.permute.xlu1 %282  ;;  %342 = vst.msk [vmem:[#allocation2 + $0x4] sm:$0xf] %vm341_vm8, %v339_v25  ;;  %vm487_vm8 = vcmask 883712  }
  0xae   : > { %286 = vst.msk [vmem:[#allocation2] sm:$0xf] %vm285_vm9, %v283_v26  ;;  %vm446_vm9 = vcmask 900096  }
  0xb0   : > { %v346_v28 = vpop.permute.xlu0 %345 }
  0xb1   : > { %v290_v29 = vpop.permute.xlu1 %289  ;;  %349 = vst.msk [vmem:[#allocation2 + $0x4] sm:$0xf] %vm348_vm13, %v346_v28  ;;  %vm412_vm13 = vcmask 556036  }
  0xb2   : > { %293 = vst.msk [vmem:[#allocation2] sm:$0xf] %vm292_vm14, %v290_v29  ;;  %vm583_vm14 = vcmask 1043456  }
  0xb3   : > { %361 = vst.msk [vmem:[#allocation2 + $0x4] sm:$0xff] %vm360_vm15, %v356_v30  ;;  %vm404_vm15 = vcmask 1039360  }
  0xb4   : > { %v297_v31 = vpop.permute.xlu0 %296 }
  0xb5   : > { %v365_v32 = vpop.permute.xlu1 %364  ;;  %300 = vst.msk [vmem:[#allocation2] sm:$0xf] %vm299_vm0, %v297_v31  ;;  %vm579_vm0 = vcmask 293888  }
  0xb6   : > { %368 = vst.msk [vmem:[#allocation2 + $0x8] sm:$0xf] %vm367_vm1, %v365_v32  ;;  %vm775_vm1 = vcmask 1047704  }
  0xb8   : > { %v372_v33 = vpop.permute.xlu0 %371 }
  0xb9   : > { %v379_v34 = vpop.permute.xlu1 %378  ;;  %375 = vst.msk [vmem:[#allocation2 + $0x8] sm:$0xf] %vm374_vm2, %v372_v33  ;;  %vm769_vm2 = vcmask 154624  }
  0xba   : > { %382 = vst.msk [vmem:[#allocation2 + $0x8] sm:$0xf] %vm381_vm3, %v379_v34  ;;  %vm778_vm3 = vcmask 711680  }
  0xbc   : > { %v1943_v35 = vld [vmem:[#allocation2] sm:$0xff] }
  0xbd   : > { %388 = vst [vmem:[#allocation4] sm:$0xf] %v1943_v35  ;;  %542 = vrot.lane.b32.xlu0 %v1943_v35, %s1788_s20  ;;  %v1950_v36 = vcombine.high %v1943_v35, %v1943_v35  ;;  %524 = vrot.lane.b32.xlu1 %v1943_v35, %s1789_s9  ;;  %v520_v37 = vcombine.low %v1943_v35, %v1943_v35 }
  0xbf   : > { %389 = vst [vmem:[#allocation4 + $0x8] sm:$0xf] %v1950_v36 }
  0xc1   : > { %544 = vrot.lane.b32.xlu0 %v1950_v36, %s1788_s20  ;;  %501 = vrot.lane.b32.xlu1 %v1943_v35, %s1790_s10  ;;  %v384_v38 = vld [vmem:[#allocation2 + $0x8] sm:$0xf] }
  0xc2   : > { %391 = vst.msk [vmem:[#allocation4 + $0x10] sm:$0xf] %vm390_vm4, %v384_v38  ;;  %v497_v39 = vld [vmem:[#allocation2 + $0x8] sm:$0xf] }
  0xc3   : > { %v456_v40 = vld [vmem:[#allocation2 + $0x8] sm:$0xf] }
  0xc4   : > { %v415_v41 = vld [vmem:[#allocation2 + $0x8] sm:$0xf] }
  0xc5   : > { %522 = vrot.lane.b32.xlu0 %v520_v37, %s1789_s9  ;;  %483 = vrot.lane.b32.xlu1 %v1943_v35, %s1791_s12  ;;  %v1674_v42 = vld [vmem:[#allocation2 + $0x8] ss:$0 sps:$4 sm:$0xff]  }
  0xc6   : > { %v538_v43 = vld [vmem:[#allocation2 + $0x8] sm:$0xf] }
  0xc7   : > { %v1675_v44 = vld [vmem:[#allocation2 + $0x8] ss:$0 sps:$4 sm:$0xff]  }
  0xc8   : > { %v1676_v45 = vld [vmem:[#allocation2 + $0x8] ss:$0 sps:$4 sm:$0xff]  }
  0xc9   : > { %481 = vrot.lane.b32.xlu0 %v520_v37, %s1791_s12  ;;  %460 = vrot.lane.b32.xlu1 %v1943_v35, %s1792_s14  ;;  %v1677_v46 = vld [vmem:[#allocation2 + $0x8] ss:$0 sps:$4 sm:$0xff]  }
  0xcd   : > { %442 = vrot.lane.b32.xlu1 %v1943_v35, %s1793_s15  ;;  %440 = vrot.lane.b32.xlu0 %v520_v37, %s1793_s15 }
  0xd1   : > { %503 = vrot.lane.b32.xlu1 %v1950_v36, %s1790_s10  ;;  %505 = vrot.lane.b32.xlu0 %v497_v39, %s1790_s10 }
  0xd5   : > { %462 = vrot.lane.b32.xlu1 %v1950_v36, %s1792_s14  ;;  %464 = vrot.lane.b32.xlu0 %v456_v40, %s1792_s14  ;;  %v557_v40 = vld [vmem:[%s2224_s1] sm:$0xff] }
  0xd9   : > { %423 = vrot.lane.b32.xlu0 %v415_v41, %s1794_s16  ;;  %421 = vrot.lane.b32.xlu1 %v1950_v36, %s1794_s16 }
  0xdd   : > { %526 = vrot.lane.b32.xlu0 %v1674_v42, %s1789_s9  ;;  %546 = vrot.lane.b32.xlu1 %v538_v43, %s1788_s20 }
  0xe1   : > { %485 = vrot.lane.b32.xlu0 %v1675_v44, %s1791_s12  ;;  %419 = vrot.lane.b32.xlu1 %v1943_v35, %s1794_s16  ;;  %v736_v44 = vlaneseq }
  0xe5   : > { %444 = vrot.lane.b32.xlu0 %v1676_v45, %s1793_s15  ;;  %400 = vrot.lane.b32.xlu1 %v1943_v35, %s1796_s17  ;;  %v737_v45 = vshrl.u32 %v736_v44, 7 }
  0xe9   : > { %402 = vrot.lane.b32.xlu0 %v1677_v46, %s1796_s17  ;;  %398 = vrot.lane.b32.xlu1 %v520_v37, %s1796_s17  ;;  %v746_v46 = vsub.s32 2, %v737_v45 }
  0xed   : > { %576 = vperm.xlu0 %1670, %v1995_v48  }
 0x12f   : > { %v543_v49 = vpop.permute.xlu0 %542  ;;  %v525_v50 = vpop.permute.xlu1 %524 }
 0x133   : > { %v545_v51 = vpop.permute.xlu0 %544  ;;  %v502_v52 = vpop.permute.xlu1 %501 }
 0x134   : > { %v549_v53 = vsel %vm548_vm6, %v543_v49, %v545_v51  ;;  %v738_v49 = vsub.s32 0, %v737_v45 }
 0x135   : > { %554 = vst [vmem:[#allocation4 + $0x60] sm:$0xf] %v549_v53 }
 0x137   : > { %v523_v54 = vpop.permute.xlu0 %522  ;;  %v484_v55 = vpop.permute.xlu1 %483 }
 0x138   : > { %v529_v56 = vsel %vm528_vm7, %v523_v54, %v525_v50 }
 0x139   : > { %534 = vst [vmem:[#allocation4 + $0x48] sm:$0xf0] %v529_v56 }
 0x13b   : > { %v482_v57 = vpop.permute.xlu0 %481  ;;  %v461_v58 = vpop.permute.xlu1 %460 }
 0x13c   : > { %v488_v59 = vsel %vm487_vm8, %v482_v57, %v484_v55  ;;  %v570_v24 = vld [vmem:[#allocation4 + $0x60] sm:$0xf] }
 0x13d   : > { %493 = vst [vmem:[#allocation4 + $0x30] sm:$0xf0] %v488_v59 }
 0x13f   : > { %v443_v60 = vpop.permute.xlu1 %442  ;;  %v441_v61 = vpop.permute.xlu0 %440 }
 0x140   : > { %v447_v62 = vsel %vm446_vm9, %v441_v61, %v443_v60 }
 0x141   : > { %452 = vst [vmem:[#allocation4 + $0x18] sm:$0xf0] %v447_v62 }
 0x143   : > { %v504_v63 = vpop.permute.xlu1 %503  ;;  %v506_v1 = vpop.permute.xlu0 %505 }
 0x144   : > { %v508_v2 = vsel %vm507_vm10, %v502_v52, %v504_v63  ;;  %v509_v3 = vsel %vm507_vm10, %v504_v63, %v506_v1  ;;  %515 = vst.msk [vmem:[#allocation4 + $0x58] sm:$0xf] %vm390_vm4, %v506_v1  ;;  %v742_v52 = vsub.s32 1, %v737_v45 }
 0x145   : > { %513 = vst [vmem:[#allocation4 + $0x48] sm:$0xf] %v508_v2  ;;  %514 = vst [vmem:[#allocation4 + $0x50] sm:$0xf] %v509_v3 }
 0x147   : > { %v463_v4 = vpop.permute.xlu1 %462  ;;  %v465_v5 = vpop.permute.xlu0 %464 }
 0x148   : > { %v467_v6 = vsel %vm466_vm11, %v461_v58, %v463_v4  ;;  %v468_v7 = vsel %vm466_vm11, %v463_v4, %v465_v5  ;;  %474 = vst.msk [vmem:[#allocation4 + $0x40] sm:$0xf] %vm390_vm4, %v465_v5 }
 0x149   : > { %472 = vst [vmem:[#allocation4 + $0x30] sm:$0xf] %v467_v6  ;;  %473 = vst [vmem:[#allocation4 + $0x38] sm:$0xf] %v468_v7  ;;  %v948_v7 = vld [vmem:[#allocation2 + $0x8] sm:$0xf] }
 0x14b   : > { %v424_v8 = vpop.permute.xlu0 %423  ;;  %v422_v9 = vpop.permute.xlu1 %421 }
 0x14c   : > { %433 = vst.msk [vmem:[#allocation4 + $0x28] sm:$0xf] %vm390_vm4, %v424_v8  ;;  %v427_v10 = vsel %vm425_vm12, %v422_v9, %v424_v8  ;;  %v567_v29 = vld [vmem:[#allocation4 + $0x48] sm:$0xff] }
 0x14d   : > { %432 = vst [vmem:[#allocation4 + $0x20] sm:$0xf] %v427_v10 }
 0x14f   : > { %v527_v11 = vpop.permute.xlu0 %526  ;;  %v547_v12 = vpop.permute.xlu1 %546 }
 0x150   : > { %v530_v13 = vsel %vm528_vm7, %v525_v50, %v527_v11  ;;  %536 = vst.msk [vmem:[#allocation4 + $0x58] sm:$0xf0] %vm412_vm13, %v527_v11  ;;  %v550_v14 = vsel %vm548_vm6, %v545_v51, %v547_v12  ;;  %v564_v34 = vld [vmem:[#allocation4 + $0x30] sm:$0xff]  ;;  %v747_v51 = vrot.slane %v734_v47, %v746_v46 }
 0x151   : > { %556 = vst.msk [vmem:[#allocation4 + $0x70] sm:$0xf] %vm390_vm4, %v547_v12  ;;  %535 = vst [vmem:[#allocation4 + $0x50] sm:$0xf0] %v530_v13 }
 0x152   : > { %555 = vst [vmem:[#allocation4 + $0x68] sm:$0xf] %v550_v14 }
 0x153   : > { %v486_v15 = vpop.permute.xlu0 %485  ;;  %v420_v16 = vpop.permute.xlu1 %419 }
 0x154   : > { %v489_v17 = vsel %vm487_vm8, %v484_v55, %v486_v15  ;;  %495 = vst.msk [vmem:[#allocation4 + $0x40] sm:$0xf0] %vm412_vm13, %v486_v15  ;;  %v426_v18 = vsel %vm425_vm12, %v420_v16, %v422_v9  ;;  %v739_v55 = vrot.slane %v734_v47, %v738_v49 }
 0x155   : > { %494 = vst [vmem:[#allocation4 + $0x38] sm:$0xf0] %v489_v17  ;;  %431 = vst [vmem:[#allocation4 + $0x18] sm:$0xf] %v426_v18 }
 0x157   : > { %v445_v19 = vpop.permute.xlu0 %444  ;;  %v401_v20 = vpop.permute.xlu1 %400  ;;  %v569_v25 = vld [vmem:[#allocation4 + $0x58] sm:$0xff] }
 0x158   : > { %v572_v21 = vld [vmem:[#allocation4 + $0x70] sm:$0xf]  ;;  %v448_v22 = vsel %vm446_vm9, %v443_v60, %v445_v19  ;;  %454 = vst.msk [vmem:[#allocation4 + $0x28] sm:$0xf0] %vm412_vm13, %v445_v19  ;;  %v743_v60 = vrot.slane %v734_v47, %v742_v52 }
 0x159   : > { %1525 = vmatpush3.msk.msra.mxu1 %vm583_vm14, %v572_v21  ;;  %v571_v23 = vld [vmem:[#allocation4 + $0x68] sm:$0xf]  ;;  %453 = vst [vmem:[#allocation4 + $0x20] sm:$0xf0] %v448_v22  ;;  %v568_v26 = vld [vmem:[#allocation4 + $0x50] sm:$0xff]  ;;  %v1799_v22 = vmov 1  }
 0x15a   : > { %1474 = vmatprep.subr.msk.mxu0 %vm583_vm14, %v571_v23  ;;  %1526 = vmatprep.subr.mxu1 %v1771_v0 }
 0x15b   : > { %1475 = vmatpush1.msk.msra.mxu0 %vm583_vm14, %v570_v24  ;;  %1527 = vmatpush3.msra.mxu1 %v569_v25  ;;  %v403_v27 = vpop.permute.xlu0 %402  ;;  %v399_v28 = vpop.permute.xlu1 %398  ;;  %v566_v30 = vld [vmem:[#allocation4 + $0x40] sm:$0xff] }
 0x15c   : > { %617 = vmatprep.subr.mxu0 %v568_v26  ;;  %1528 = vmatprep.subr.mxu1 %v1771_v0  ;;  %v406_v31 = vsel %vm404_vm15, %v401_v20, %v403_v27  ;;  %413 = vst.msk [vmem:[#allocation4 + $0x10] sm:$0xf0] %vm412_vm13, %v403_v27  ;;  %v405_v32 = vsel %vm404_vm15, %v399_v28, %v401_v20  ;;  %v565_v33 = vld [vmem:[#allocation4 + $0x38] sm:$0xff]  ;;  %vm1366_vm13 = vcmask 392512  }
 0x15d   : > { %618 = vmatpush1.msra.mxu0 %v567_v29  ;;  %1529 = vmatpush3.msra.mxu1 %v566_v30  ;;  %411 = vst [vmem:[#allocation4 + $0x8] sm:$0xf0] %v406_v31  ;;  %410 = vst [vmem:[#allocation4] sm:$0xf0] %v405_v32  ;;  %v561_v39 = vld [vmem:[#allocation4 + $0x18] sm:$0xff] }
 0x15e   : > { %619 = vmatprep.subr.mxu0 %v565_v33  ;;  %1530 = vmatprep.subr.mxu1 %v1771_v0 }
 0x15f   : > { %620 = vmatpush1.msra.mxu0 %v564_v34  ;;  %v563_v37 = vld [vmem:[#allocation4 + $0x28] sm:$0xff]  ;;  %1671 = vset.pattern.permute.xlu0 %v1799_v22 }
 0x160   : > { %1531 = vmatpush3.msra.mxu1 %v563_v37  ;;  %v562_v38 = vld [vmem:[#allocation4 + $0x20] sm:$0xff] }
 0x161   : > { %621 = vmatprep.subr.mxu0 %v562_v38  ;;  %1532 = vmatprep.subr.mxu1 %v1771_v0 }
 0x162   : > { %622 = vmatpush1.msra.mxu0 %v561_v39 }
 0x163   : > { %v560_v41 = vld [vmem:[#allocation4 + $0x10] sm:$0xff] }
 0x164   : > { %1533 = vmatpush3.msra.mxu1 %v560_v41  ;;  %v559_v42 = vld [vmem:[#allocation4 + $0x8] sm:$0xff]  ;;  %v558_v43 = vld [vmem:[#allocation4] sm:$0xff] }
 0x165   : > { %623 = vmatprep.subr.mxu0 %v559_v42  ;;  %1535 = vmatmul.mubr.msk.f32.vlgmr.msra.gmra.mxu1 %vm579_vm0, %v557_v40 }
 0x166   : > { %624 = vmatpush1.msra.mxu0 %v558_v43  ;;  %1537 = vmatprep.subr.mxu1 %v1771_v0 }
 0x167   : > { %1476 = vmatmul.mubr.msk.f32.vlgmr.msra.gmra.mxu0 %vm579_vm0, %v557_v40  ;;  %1557 = vmatprep.mubr.msk.f32.mxu1 %vm1795_vm5, %v1771_v0  ;;  %vm1003_vm5 = vcmask 621568  }
 0x168   : > { %1080 = vmatprep.mubr.f32.mxu0 %v1771_v0  ;;  %v577_v50 = vpop.permute.xlu0 %576 }
 0x225   : > { %v730_v53 = vpop.f32.mrf.mxu1 }
 0x226   : > { %v731_v54 = vadd.f32 %v730_v53, %v577_v50 }
 0x227   : > { %v659_v56 = vpop.f32.mrf.mxu0  ;;  %v1536_v57 = vpop.f32.mrf.mxu1 }
 0x228   : > { %v753_v58 = vmul.f32 %v747_v51, %v731_v54  ;;  %v660_v59 = vadd.f32 %v659_v56, %v577_v50 }
 0x229   : > { %v661_v61 = vpop.f32.mrf.mxu0 }
 0x22a   : > { %v756_v62 = vmul.f32 0.2, %v753_v58  ;;  %v751_v63 = vmul.f32 %v739_v55, %v660_v59  ;;  %v662_v1 = vadd.f32 %v661_v61, %v577_v50 }
 0x22c   : > { %v754_v2 = vmul.f32 0.2, %v751_v63  ;;  %v752_v3 = vmul.f32 %v743_v60, %v662_v1  ;;  %v759_v4 = vmax.f32 %v753_v58, %v756_v62 }
 0x22e   : > { %v755_v5 = vmul.f32 0.2, %v752_v3  ;;  %767 = vrot.lane.b32.xlu0 %v759_v4, %s1798_s18  ;;  %v757_v6 = vmax.f32 %v751_v63, %v754_v2 }
 0x230   : > { %763 = vrot.lane.b32.xlu1 %v757_v6, %s1798_s18  ;;  %v758_v8 = vmax.f32 %v752_v3, %v755_v5 }
 0x232   : > { %956 = vrot.lane.b32.xlu0 %v948_v7, %s1792_s14 }
 0x234   : > { %765 = vrot.lane.b32.xlu1 %v758_v8, %s1798_s18  ;;  %s1804_s18 = smov 113  }
 0x238   : > { %954 = vrot.lane.b32.xlu1 %v1950_v36, %s1792_s14 }
 0x23c   : > { %952 = vrot.lane.b32.xlu1 %v1943_v35, %s1792_s14 }
 0x2a0   : > { %v768_v9 = vpop.permute.xlu0 %767 }
 0x2a2   : > { %v764_v10 = vpop.permute.xlu1 %763 }
 0x2a3   : > { %776 = vst.msk [vmem:[#allocation3] sm:$0xff] %vm775_vm1, %v764_v10 }
 0x2a4   : > { %v957_v11 = vpop.permute.xlu0 %956 }
 0x2a5   : > { %965 = vst.msk [vmem:[#allocation4 + $0xe8] sm:$0xf] %vm390_vm4, %v957_v11  ;;  %vm785_vm4 = vcmask 556032  }
 0x2a6   : > { %v766_v12 = vpop.permute.xlu1 %765 }
 0x2a7   : > { %v2042_v13 = vsel %vm769_vm2, %v764_v10, %v766_v12  ;;  %v771_v14 = vsel %vm769_vm2, %v766_v12, %v768_v9  ;;  %v966_v9 = vld [vmem:[%s2225_s2] sm:$0xff]  ;;  %v1206_v12 = vld [vmem:[%s2228_s5 + $0x8] sm:$0xff] }
 0x2a8   : > { %779 = vst.msk [vmem:[#allocation3 + $0x10] sm:$0xff] %vm778_vm3, %v771_v14  ;;  %784 = vst [vmem:[#allocation4 + $0x8] sm:$0xff] %v2042_v13 }
 0x2aa   : > { %v2045_v36 = vld [vmem:[#allocation3] sm:$0xff]  ;;  %v955_v15 = vpop.permute.xlu1 %954 }
 0x2ab   : > { %783 = vst [vmem:[#allocation4] sm:$0xff] %v2045_v36  ;;  %v959_v35 = vsel %vm466_vm11, %v955_v15, %v957_v11  ;;  %933 = vrot.lane.b32.xlu0 %v2045_v36, %s1788_s20  ;;  %913 = vrot.lane.b32.xlu1 %v2045_v36, %s1789_s9 }
 0x2ac   : > { %964 = vst [vmem:[#allocation4 + $0xe0] sm:$0xf] %v959_v35  ;;  %v996_v16 = vld [vmem:[#allocation4 + $0xe8] sm:$0xf] }
 0x2ad   : > { %1538 = vmatpush3.msk.msra.mxu1 %vm583_vm14, %v996_v16 }
 0x2ae   : > { %v953_v17 = vpop.permute.xlu1 %952  ;;  %1539 = vmatprep.subr.mxu1 %v1771_v0 }
 0x2af   : > { %v782_v18 = vld [vmem:[#allocation3 + $0x10] sm:$0xff]  ;;  %v958_v19 = vsel %vm466_vm11, %v953_v17, %v955_v15  ;;  %893 = vrot.lane.b32.xlu0 %v2045_v36, %s1790_s10  ;;  %873 = vrot.lane.b32.xlu1 %v2045_v36, %s1791_s12 }
 0x2b0   : > { %963 = vst [vmem:[#allocation4 + $0xd8] sm:$0xf] %v958_v19  ;;  %786 = vst.msk [vmem:[#allocation4 + $0x10] sm:$0xff] %vm785_vm4, %v782_v18 }
 0x2b3   : > { %853 = vrot.lane.b32.xlu0 %v2045_v36, %s1792_s14  ;;  %833 = vrot.lane.b32.xlu1 %v2045_v36, %s1793_s15  ;;  %v995_v20 = vld [vmem:[#allocation4 + $0xe0] sm:$0xf] }
 0x2b4   : > { %1479 = vmatprep.subr.msk.mxu0 %vm583_vm14, %v995_v20 }
 0x2b7   : > { %813 = vrot.lane.b32.xlu0 %v2045_v36, %s1794_s16  ;;  %937 = vrot.lane.b32.xlu1 %v782_v18, %s1788_s20  ;;  %v994_v21 = vld [vmem:[#allocation4 + $0xd8] sm:$0xf]  ;;  %v969_v11 = vld [vmem:[#allocation4 + $0x10] sm:$0xff] }
 0x2b8   : > { %1480 = vmatpush1.msk.msra.mxu0 %vm583_vm14, %v994_v21  ;;  %vm1372_vm14 = vcmask 458112  }
 0x2bb   : > { %935 = vrot.lane.b32.xlu0 %v2042_v13, %s1788_s20  ;;  %915 = vrot.lane.b32.xlu1 %v2042_v13, %s1789_s9  ;;  %s1805_s20 = smov 93  }
 0x2bf   : > { %917 = vrot.lane.b32.xlu0 %v782_v18, %s1789_s9  ;;  %897 = vrot.lane.b32.xlu1 %v782_v18, %s1790_s10  ;;  %s1806_s9 = smov 21  }
 0x2c3   : > { %895 = vrot.lane.b32.xlu0 %v2042_v13, %s1790_s10  ;;  %875 = vrot.lane.b32.xlu1 %v2042_v13, %s1791_s12 }
 0x2c7   : > { %877 = vrot.lane.b32.xlu0 %v782_v18, %s1791_s12  ;;  %857 = vrot.lane.b32.xlu1 %v782_v18, %s1792_s14  ;;  %s1807_s12 = smov 8  }
 0x2cb   : > { %855 = vrot.lane.b32.xlu0 %v2042_v13, %s1792_s14  ;;  %835 = vrot.lane.b32.xlu1 %v2042_v13, %s1793_s15 }
 0x2cf   : > { %837 = vrot.lane.b32.xlu0 %v782_v18, %s1793_s15  ;;  %817 = vrot.lane.b32.xlu1 %v782_v18, %s1794_s16 }
 0x2d3   : > { %815 = vrot.lane.b32.xlu0 %v2042_v13, %s1794_s16  ;;  %795 = vrot.lane.b32.xlu1 %v2042_v13, %s1796_s17  ;;  %s1808_s16 = smov 32  }
 0x2d7   : > { %797 = vrot.lane.b32.xlu0 %v782_v18, %s1796_s17  ;;  %793 = vrot.lane.b32.xlu1 %v2045_v36, %s1796_s17  ;;  %s1800_s17 = smov 37  }
 0x2db   : > { %1000 = vperm.xlu0 %1671, %v1995_v48  }
 0x31d   : > { %v934_v23 = vpop.permute.xlu0 %933  ;;  %v914_v24 = vpop.permute.xlu1 %913 }
 0x321   : > { %v894_v25 = vpop.permute.xlu0 %893  ;;  %v874_v26 = vpop.permute.xlu1 %873 }
 0x325   : > { %v854_v27 = vpop.permute.xlu0 %853  ;;  %v834_v28 = vpop.permute.xlu1 %833 }
 0x329   : > { %v2096_v29 = vpop.permute.xlu0 %813  ;;  %v938_v30 = vpop.permute.xlu1 %937 }
 0x32a   : > { %946 = vst.msk [vmem:[#allocation4 + $0xd0] sm:$0xff] %vm785_vm4, %v938_v30 }
 0x32d   : > { %v936_v31 = vpop.permute.xlu0 %935  ;;  %v916_v32 = vpop.permute.xlu1 %915 }
 0x32e   : > { %v939_v33 = vsel %vm548_vm6, %v934_v23, %v936_v31  ;;  %v940_v34 = vsel %vm548_vm6, %v936_v31, %v938_v30  ;;  %v919_v37 = vsel %vm528_vm7, %v914_v24, %v916_v32  ;;  %vm1161_vm6 = vcmask 130048  }
 0x32f   : > { %1030 = vmatprep.subr.mxu0 %v940_v34 }
 0x330   : > { %1031 = vmatpush1.msra.mxu0 %v939_v33 }
 0x331   : > { %v918_v48 = vpop.permute.xlu0 %917  ;;  %v898_v38 = vpop.permute.xlu1 %897  ;;  %v993_v39 = vld [vmem:[#allocation4 + $0xd0] sm:$0xff] }
 0x332   : > { %v920_v40 = vsel %vm528_vm7, %v916_v32, %v918_v48  ;;  %926 = vst.msk [vmem:[#allocation4 + $0xb8] sm:$0xff] %vm785_vm4, %v918_v48  ;;  %906 = vst.msk [vmem:[#allocation4 + $0xa0] sm:$0xff] %vm785_vm4, %v898_v38  ;;  %1540 = vmatpush3.msra.mxu1 %v993_v39  ;;  %vm1176_vm7 = vcmask 7168  }
 0x333   : > { %1541 = vmatprep.subr.mxu1 %v1771_v0  ;;  %1032 = vmatprep.subr.mxu0 %v920_v40 }
 0x334   : > { %1033 = vmatpush1.msra.mxu0 %v919_v37 }
 0x335   : > { %v896_v41 = vpop.permute.xlu0 %895  ;;  %v876_v42 = vpop.permute.xlu1 %875 }
 0x336   : > { %v899_v43 = vsel %vm507_vm10, %v894_v25, %v896_v41  ;;  %v900_v44 = vsel %vm507_vm10, %v896_v41, %v898_v38  ;;  %v879_v45 = vsel %vm487_vm8, %v874_v26, %v876_v42  ;;  %vm1348_vm10 = vcmask 195712  }
 0x337   : > { %1034 = vmatprep.subr.mxu0 %v900_v44 }
 0x338   : > { %1035 = vmatpush1.msra.mxu0 %v899_v43 }
 0x339   : > { %v878_v46 = vpop.permute.xlu0 %877  ;;  %v858_v47 = vpop.permute.xlu1 %857  ;;  %v990_v49 = vld [vmem:[#allocation4 + $0xb8] sm:$0xff]  ;;  %v987_v51 = vld [vmem:[#allocation4 + $0xa0] sm:$0xff] }
 0x33a   : > { %v880_v50 = vsel %vm487_vm8, %v876_v42, %v878_v46  ;;  %886 = vst.msk [vmem:[#allocation4 + $0x88] sm:$0xff] %vm785_vm4, %v878_v46  ;;  %866 = vst.msk [vmem:[#allocation4 + $0x70] sm:$0xff] %vm785_vm4, %v858_v47  ;;  %1542 = vmatpush3.msra.mxu1 %v990_v49  ;;  %vm1336_vm8 = vcmask 64512  }
 0x33b   : > { %1543 = vmatprep.subr.mxu1 %v1771_v0  ;;  %1036 = vmatprep.subr.mxu0 %v880_v50 }
 0x33c   : > { %1544 = vmatpush3.msra.mxu1 %v987_v51  ;;  %1037 = vmatpush1.msra.mxu0 %v879_v45 }
 0x33d   : > { %v856_v52 = vpop.permute.xlu0 %855  ;;  %v836_v53 = vpop.permute.xlu1 %835  ;;  %1545 = vmatprep.subr.mxu1 %v1771_v0 }
 0x33e   : > { %v859_v54 = vsel %vm466_vm11, %v854_v27, %v856_v52  ;;  %v860_v55 = vsel %vm466_vm11, %v856_v52, %v858_v47  ;;  %v839_v56 = vsel %vm446_vm9, %v834_v28, %v836_v53  ;;  %vm1354_vm11 = vcmask 261312  }
 0x33f   : > { %864 = vst [vmem:[#allocation4 + $0x60] sm:$0xff] %v859_v54  ;;  %865 = vst [vmem:[#allocation4 + $0x68] sm:$0xff] %v860_v55  ;;  %1038 = vmatprep.subr.mxu0 %v860_v55 }
 0x340   : > { %844 = vst [vmem:[#allocation4 + $0x48] sm:$0xff] %v839_v56  ;;  %1039 = vmatpush1.msra.mxu0 %v859_v54 }
 0x341   : > { %v838_v57 = vpop.permute.xlu0 %837  ;;  %v818_v58 = vpop.permute.xlu1 %817  ;;  %v984_v59 = vld [vmem:[#allocation4 + $0x88] sm:$0xff]  ;;  %v981_v61 = vld [vmem:[#allocation4 + $0x70] sm:$0xff] }
 0x342   : > { %v840_v60 = vsel %vm446_vm9, %v836_v53, %v838_v57  ;;  %846 = vst.msk [vmem:[#allocation4 + $0x58] sm:$0xff] %vm785_vm4, %v838_v57  ;;  %826 = vst.msk [vmem:[#allocation4 + $0x40] sm:$0xff] %vm785_vm4, %v818_v58  ;;  %1546 = vmatpush3.msra.mxu1 %v984_v59  ;;  %vm1342_vm9 = vcmask 130112  }
 0x343   : > { %845 = vst [vmem:[#allocation4 + $0x50] sm:$0xff] %v840_v60  ;;  %1547 = vmatprep.subr.mxu1 %v1771_v0  ;;  %1040 = vmatprep.subr.mxu0 %v840_v60 }
 0x344   : > { %1548 = vmatpush3.msra.mxu1 %v981_v61  ;;  %1041 = vmatpush1.msra.mxu0 %v839_v56 }
 0x345   : > { %v816_v62 = vpop.permute.xlu0 %815  ;;  %v796_v63 = vpop.permute.xlu1 %795  ;;  %1549 = vmatprep.subr.mxu1 %v1771_v0 }
 0x346   : > { %v819_v1 = vsel %vm425_vm12, %v2096_v29, %v816_v62  ;;  %v820_v2 = vsel %vm425_vm12, %v816_v62, %v818_v58  ;;  %vm1360_vm12 = vcmask 326912  }
 0x347   : > { %824 = vst [vmem:[#allocation4 + $0x30] sm:$0xff] %v819_v1  ;;  %825 = vst [vmem:[#allocation4 + $0x38] sm:$0xff] %v820_v2  ;;  %1042 = vmatprep.subr.mxu0 %v820_v2 }
 0x348   : > { %1043 = vmatpush1.msra.mxu0 %v819_v1 }
 0x349   : > { %v798_v3 = vpop.permute.xlu0 %797  ;;  %v794_v4 = vpop.permute.xlu1 %793  ;;  %v978_v5 = vld [vmem:[#allocation4 + $0x58] sm:$0xff]  ;;  %v975_v8 = vld [vmem:[#allocation4 + $0x40] sm:$0xff] }
 0x34a   : > { %v800_v6 = vsel %vm404_vm15, %v796_v63, %v798_v3  ;;  %806 = vst.msk [vmem:[#allocation4 + $0x28] sm:$0xff] %vm785_vm4, %v798_v3  ;;  %v799_v7 = vsel %vm404_vm15, %v794_v4, %v796_v63  ;;  %1550 = vmatpush3.msra.mxu1 %v978_v5  ;;  %vm1378_vm15 = vcmask 523712  }
 0x34b   : > { %805 = vst [vmem:[#allocation4 + $0x20] sm:$0xff] %v800_v6  ;;  %804 = vst [vmem:[#allocation4 + $0x18] sm:$0xff] %v799_v7  ;;  %1551 = vmatprep.subr.mxu1 %v1771_v0  ;;  %1044 = vmatprep.subr.mxu0 %v800_v6 }
 0x34c   : > { %1552 = vmatpush3.msra.mxu1 %v975_v8  ;;  %1045 = vmatpush1.msra.mxu0 %v799_v7 }
 0x34d   : > { %1553 = vmatprep.subr.mxu1 %v1771_v0  ;;  %1046 = vmatprep.subr.mxu0 %v2042_v13  ;;  %v1205_v13 = vld [vmem:[%s2228_s5] sm:$0xff] }
 0x34e   : > { %1047 = vmatpush1.msra.mxu0 %v2045_v36 }
 0x34f   : > { %1481 = vmatmul.mubr.msk.f32.vlgmr.msra.gmra.mxu0 %vm1003_vm5, %v966_v9  ;;  %1560 = vmatprep.subr.mxu0 %v1206_v12 }
 0x350   : > { %1561 = vmatpush3.msra.mxu0 %v1206_v12 }
 0x351   : > { %v972_v10 = vld [vmem:[#allocation4 + $0x28] sm:$0xff]  ;;  %1562 = vmatprep.subr.mxu0 %v1205_v13 }
 0x352   : > { %1554 = vmatpush3.msra.mxu1 %v972_v10  ;;  %1563 = vmatpush3.msra.mxu0 %v1205_v13 }
 0x353   : > { %1555 = vmatprep.subr.mxu1 %v1771_v0 }
 0x354   : > { %1556 = vmatpush3.msra.mxu1 %v969_v11 }
 0x355   : > { %1558 = vmatmul.mubr.msk.f32.vlgmr.msra.gmra.mxu1 %vm1003_vm5, %v966_v9  ;;  %1576 = vmatprep.subr.mxu1 %v1206_v12 }
 0x356   : > { %v1001_v14 = vpop.permute.xlu0 %1000  ;;  %1578 = vmatpush3.msra.mxu1 %v1206_v12 }
 0x357   : > { %1577 = vmatprep.subr.mxu1 %v1205_v13 }
 0x358   : > { %1579 = vmatpush3.msra.mxu1 %v1205_v13 }
 0x40f   : > { %v1082_v36 = vpop.f32.mrf.mxu0 }
 0x410   : > { %v1083_v0 = vadd.f32 %v1082_v36, %v1001_v14 }
 0x411   : > { %v1084_v15 = vpop.f32.mrf.mxu0 }
 0x412   : > { %1167 = vrot.lane.b32.xlu0 %v1083_v0, %s1800_s17  ;;  %1158 = vrot.lane.b32.xlu1 %v1083_v0, %s1792_s14  ;;  %v1085_v35 = vadd.f32 %v1084_v15, %v1001_v14  ;;  %s255_s14 = sand.u32 1, %s1760_s22   ;;  %s1809_s17 = smov 24  }
 0x413   : > { %s1471_s10 = sshll.u32 %s255_s14, 3 }
 0x414   : > { %s2162_s15 = scalar_lea.vmem [#allocation9], %s1471_s10 }
 0x415   : > { %v1153_v16 = vpop.f32.mrf.mxu1 }
 0x416   : > { %1174 = vrot.lane.b32.xlu0 %v1085_v35, %s1801_s19  ;;  %1163 = vrot.lane.b32.xlu1 %v1083_v0, %s1802_s28  ;;  %v1154_v18 = vadd.f32 %v1153_v16, %v1001_v14 }
 0x417   : > { %v1559_v17 = vpop.f32.mrf.mxu1 }
 0x41a   : > { %1184 = vrot.lane.b32.xlu0 %v1085_v35, %s1803_s29  ;;  %1172 = vrot.lane.b32.xlu1 %v1083_v0, %s1801_s19  ;;  %s1810_s19 = smov 16  }
 0x41e   : > { %1193 = vrot.lane.b32.xlu0 %v1154_v18, %s1804_s18  ;;  %1180 = vrot.lane.b32.xlu1 %v1085_v35, %s1805_s20  ;;  %s1811_s20 = smov [#allocation9]  }
 0x422   : > { %1188 = vrot.lane.b32.xlu1 %v1085_v35, %s1806_s9  ;;  %s1708_s9 = sshll.u32 %s1811_s20, 4  ;;  %s1709_s9 = int_to_ptr.vmem [resolvable:$false] %s1708_s9 }
 0x423   : > { %s1710_s10 = scalar_lea.vmem %s1709_s9, 256 }
 0x484   : > { %v1168_v19 = vpop.permute.xlu0 %1167  ;;  %v1159_v20 = vpop.permute.xlu1 %1158 }
 0x485   : > { %1170 = vst.msk [vmem:[#allocation5 + $0x10] sm:$0xff] %vm1161_vm6, %v1168_v19  ;;  %1162 = vst.msk [vmem:[#allocation5] sm:$0xff] %vm1161_vm6, %v1159_v20 }
 0x488   : > { %v1175_v21 = vpop.permute.xlu0 %1174  ;;  %v1164_v22 = vpop.permute.xlu1 %1163 }
 0x489   : > { %1166 = vst.msk [vmem:[#allocation5 + $0x8] sm:$0xff] %vm1161_vm6, %v1164_v22 }
 0x48c   : > { %v1185_v23 = vpop.permute.xlu0 %1184  ;;  %v1173_v24 = vpop.permute.xlu1 %1172  ;;  %v1197_v25 = vld [vmem:[#allocation5] sm:$0xff]  ;;  %v1199_v30 = vld [vmem:[#allocation5 + $0x10] sm:$0xff] }
 0x48d   : > { %1187 = vst.msk [vmem:[#allocation5 + $0x28] sm:$0xff] %vm1161_vm6, %v1185_v23  ;;  %v1177_v26 = vsel %vm1176_vm7, %v1173_v24, %v1175_v21  ;;  %1564 = vmatprep.mubr.msk.f32.mxu0 %vm1161_vm6, %v1197_v25 }
 0x48e   : > { %1179 = vst.msk [vmem:[#allocation5 + $0x18] sm:$0xff] %vm1161_vm6, %v1177_v26 }
 0x490   : > { %v1194_v27 = vpop.permute.xlu0 %1193  ;;  %v1181_v28 = vpop.permute.xlu1 %1180  ;;  %v1198_v29 = vld [vmem:[#allocation5 + $0x8] sm:$0xff] }
 0x491   : > { %1196 = vst.msk [vmem:[#allocation5 + $0x38] sm:$0xff] %vm1161_vm6, %v1194_v27  ;;  %1183 = vst.msk [vmem:[#allocation5 + $0x20] sm:$0xff] %vm1161_vm6, %v1181_v28  ;;  %1565 = vmatmul.mubr.msk.f32.vlgmr.msra.gmra.mxu0 %vm1161_vm6, %v1198_v29 }
 0x492   : > { %1567 = vmatprep.mubr.msk.f32.mxu0 %vm1161_vm6, %v1199_v30 }
 0x494   : > { %v1189_v31 = vpop.permute.xlu1 %1188  ;;  %v1202_v34 = vld [vmem:[#allocation5 + $0x28] sm:$0xff] }
 0x495   : > { %1191 = vst.msk [vmem:[#allocation5 + $0x30] sm:$0xff] %vm1161_vm6, %v1189_v31  ;;  %v1200_v32 = vld [vmem:[#allocation5 + $0x18] sm:$0xff] }
 0x496   : > { %1568 = vmatmul.mubr.msk.f32.gmra.mxu0 %vm1161_vm6, %v1200_v32 }
 0x498   : > { %v1201_v33 = vld [vmem:[#allocation5 + $0x20] sm:$0xff]  ;;  %v1204_v48 = vld [vmem:[#allocation5 + $0x38] sm:$0xff] }
 0x499   : > { %1570 = vmatprep.mubr.msk.f32.mxu1 %vm1161_vm6, %v1201_v33 }
 0x49a   : > { %1571 = vmatmul.mubr.msk.f32.vlgmr.msra.gmra.mxu1 %vm1161_vm6, %v1202_v34 }
 0x49c   : > { %v1203_v37 = vld [vmem:[#allocation5 + $0x30] sm:$0xff] }
 0x49d   : > { %1573 = vmatprep.mubr.msk.f32.mxu1 %vm1161_vm6, %v1203_v37 }
 0x49e   : > { %1574 = vmatmul.mubr.msk.f32.gmra.mxu1 %vm1161_vm6, %v1204_v48 }
 0x551   : > { %v1566_v38 = vpop.f32.mrf.mxu0 }
 0x552   : > { %1339 = vrot.lane.b32.xlu1 %v1566_v38, %s1807_s12 }
 0x553   : > { %v1297_v39 = vpop.f32.mrf.mxu0 }
 0x554   : > { %1337 = vst.msk [vmem:[%s2162_s15] sm:$0xff] %vm1336_vm8, %v1297_v39 }
 0x556   : > { %v1569_v41 = vpop.f32.mrf.mxu0 }
 0x558   : > { %v1307_v43 = vpop.f32.mrf.mxu0 }
 0x55a   : > { %v1572_v40 = vpop.f32.mrf.mxu1 }
 0x55b   : > { %1363 = vrot.lane.b32.xlu1 %v1572_v40, %s1779_s13 }
 0x55c   : > { %v1317_v42 = vpop.f32.mrf.mxu1 }
 0x55d   : > { %1357 = vrot.lane.b32.xlu0 %v1317_v42, %s1808_s16 }
 0x55e   : > { %v1575_v44 = vpop.f32.mrf.mxu1 }
 0x55f   : > { %1351 = vrot.lane.b32.xlu1 %v1569_v41, %s1809_s17 }
 0x560   : > { %v1327_v45 = vpop.f32.mrf.mxu1 }
 0x561   : > { %1345 = vrot.lane.b32.xlu0 %v1307_v43, %s1810_s19 }
 0x563   : > { %1375 = vrot.lane.b32.xlu1 %v1575_v44, %s1777_s11  ;;  %s1493_s11 = sshll.u32 %s1868_s25, 7  ;;  %s1381_s25 = scalar_lea.sflag [#allocation8], %s255_s14 }
 0x564   : > { %s2178_s29 = scalar_lea.hbm %s2229_s6, %s1493_s11 }
 0x565   : > { %1369 = vrot.lane.b32.xlu0 %v1327_v45, %s1772_s26  ;;  %s1394_s26 = sshll.u32 %s2162_s15, 4  ;;  %s2180_s26 = int_to_ptr.vmem [resolvable:$true] %s1394_s26 }
 0x566   : > { %s1704_s18 = scalar_lea.vmem %s2180_s26, 128  ;;  %p1711_p13 = scmp.lt.s32.totalorder %s2180_s26, %s1709_s9 }
 0x567   : > { %p1705_p9 = scmp.ne.s32.totalorder %s2180_s26, %s1704_s18  ;;  %p1712_p0 = scmp.lt.s32.totalorder %s1710_s10, %s1704_s18 }
 0x569   : > { %p1706_p10 = pnand %p1705_p9, %p1885_p5  ;;  %p1713_p1 = por %p1712_p0, %p1711_p13 }
 0x56b   : > { %p1707_p12 = pneg %p1706_p10 }
 0x56d   : > { %p1714_p2 = pnand %p1713_p1, %p1707_p12 }
 0x5c4   : > { %v1340_v46 = vpop.permute.xlu1 %1339 }
 0x5c5   : > { %1343 = vst.msk [vmem:[%s2162_s15] sm:$0xff] %vm1342_vm9, %v1340_v46 }
 0x5cd   : > { %v1364_v47 = vpop.permute.xlu1 %1363 }
 0x5cf   : > { %v1358_v49 = vpop.permute.xlu0 %1357 }
 0x5d1   : > { %v1352_v50 = vpop.permute.xlu1 %1351 }
 0x5d3   : > { %v1346_v51 = vpop.permute.xlu0 %1345 }
 0x5d4   : > { %1349 = vst.msk [vmem:[%s2162_s15] sm:$0xff] %vm1348_vm10, %v1346_v51 }
 0x5d5   : > { %1355 = vst.msk [vmem:[%s2162_s15] sm:$0xff] %vm1354_vm11, %v1352_v50  ;;  %v1376_v53 = vpop.permute.xlu1 %1375 }
 0x5d6   : > { %1361 = vst.msk [vmem:[%s2162_s15] sm:$0xff] %vm1360_vm12, %v1358_v49 }
 0x5d7   : > { %v1370_v52 = vpop.permute.xlu0 %1369  ;;  %1367 = vst.msk [vmem:[%s2162_s15] sm:$0xff] %vm1366_vm13, %v1364_v47 }
 0x5d8   : > { %1373 = vst.msk [vmem:[%s2162_s15] sm:$0xff] %vm1372_vm14, %v1370_v52 }
 0x5d9   : > { %1379 = vst.msk [vmem:[%s2162_s15] sm:$0xff] %vm1378_vm15, %v1376_v53 }
 0x5da   : > { %1717 = shalt.err (!%p1714_p2)
}
 0x5db   : > { %s1718_s12 = scalar_lea.hbm %s2178_s29, 128  ;;  %s1722_s16 = scalar_lea.hbm %s2229_s6, 256 }
 0x5dc   : > { %p1719_p3 = scmp.ne.s32.totalorder %s2178_s29, %s1718_s12  ;;  %p1723_p8 = scmp.lt.s32.totalorder %s2178_s29, %s2229_s6 }
 0x5dd   : > { %p1724_p11 = scmp.lt.s32.totalorder %s1722_s16, %s1718_s12 }
 0x5de   : > { %p1720_p4 = pnand %p1719_p3, %p1885_p5 }
 0x5df   : > { %p1725_p9 = por %p1724_p11, %p1723_p8 }
 0x5e0   : > { %p1721_p7 = pneg %p1720_p4 }
 0x5e2   : > { %p1726_p10 = pnand %p1725_p9, %p1721_p7 }
 0x5e4   : > { %1729 = shalt.err (!%p1726_p10)
}
 0x5e5   : > { %1584 = dma.vmem_to_hbm [thread:$0]  (%p1885_p5), %s2180_s26, 128, %s2178_s29, %s1381_s25  }
 0x5e6 PF: > { %p1596_p12 = scmp.ge.s32.totalorder %s1768_s24, 2  ;;  %s1406_s11 = sand.u32 1, %s1756_s21  }
 0x5e7   : > { %s1407_s13 = scalar_lea.sflag [#allocation8], %s1406_s11 }
 0x5e8   : > { %p1591_p13 = pnand %p1596_p12, %p1889_p6 }
 0x5ea   : > { %p1592_p0 = pneg %p1591_p13 }
 0x5ec   : > { %1751 = dma.done.wait (%p1592_p0), %s1407_s13, 128  }
 0x5ed   : > { %1753 = vsyncadd (%p1592_p0), %s1407_s13, 4294967168  ;;  %p17_p1 = scmp.ge.s32.totalorder %s1872_s27, 4   ;;  %s2233_s21 = smov %s1760_s22 }
 0x5ee   : > { %s2234_s22 = smov %s1764_s23  ;;  %s2235_s23 = smov %s1883_s30 }
 0x5ef   : > { %s2236_s24 = smov %s1872_s27  ;;  %19 = sbr.rel (!%p17_p1) target bundleno = 4 (0x4), region = 84 }
 0x5f4   :  { %1412 = vsyncpa [#allocation7], 1 }
 0x5f5   :  { %1414 = vsyncpa [#allocation7 + $0x1], 1 }
 0x5f6   :  { %1415 = vsyncpa [#allocation8], 1 }
 0x5f7   :  { %1417 = vsyncpa [#allocation8 + $0x1], 1 }

</bundles_post_ra>
